<compile_context>
chip_gen: v7x
topology: tpu7x:2x2x1
jax: 0.10.0
libtpu: 0.0.40
codegen_flags: <defaults>
</compile_context>

<pallas_src>
import jax
import jax.numpy as jnp
from jax import lax
from jax.experimental import pallas as pl
from jax.experimental.pallas import tpu as pltpu


_LANE = 128      # vreg lane width / MXU tile edge
_SUBLANE = 8     # vreg sublane count
_STD_FLOOR = 1e-8


def _round_up(x, m):
    return ((x + m - 1) // m) * m


def _pad_to(a, shape):
    pads = [(0, s - d) for d, s in zip(a.shape, shape)]
    return jnp.pad(a, pads)


def _softplus(x):
    # numerically stable softplus (VPU/EUP ops)
    return jnp.maximum(x, 0.0) + jnp.log1p(jnp.exp(-jnp.abs(x)))


def _rnn_nar_kernel(x_enc_ref, x_dec_ref,
                    w_ih_e_ref, w_hh_e_ref, b_e_ref,
                    w_ih_d_ref, w_hh_d_ref, b_d_ref,
                    w_head_ref, b_head_ref,
                    out_ref,
                    h_scr, pe_scr, pd_scr, hh_scr):
    """Encoder RNN -> decoder RNN (non-AR) -> packed [mu, d, v, std] output.

    x_enc_ref : (Tin,  Bb, 1+F)  f32, time-major batch block
    x_dec_ref : (Tout, Bb, F)    f32, time-major batch block
    weights   : bf16 (biases f32), hidden dim zero-padded to Hp (x128)
    out_ref   : (Tout, Bb, 4)    f32 packed [mu, pred_d, pred_v, pred_std]
    scratch   : h (Bb,Hp), enc/dec input projections, decoder hidden history
    """
    Tin, Bb, De = x_enc_ref.shape
    Tout, _, Fd = x_dec_ref.shape
    Hp = w_hh_e_ref.shape[0]

    # Loop-invariant weights loaded ONCE (no per-iteration vld/broadcast inside
    # the unrolled recurrences).
    w_hh_e = w_hh_e_ref[...]
    w_hh_d = w_hh_d_ref[...]

    # ---- hoisted input projections: one MXU matmul per sequence -------------
    # Bb == 8 sublanes and f32 32-bit layout make these reshapes tile-exact.
    xe = x_enc_ref[...].reshape(Tin * Bb, De).astype(jnp.bfloat16)
    pe = jnp.dot(xe, w_ih_e_ref[...],
                 preferred_element_type=jnp.float32) + b_e_ref[...]
    pe_scr[...] = pe.reshape(Tin, Bb, Hp)

    xd = x_dec_ref[...].reshape(Tout * Bb, Fd).astype(jnp.bfloat16)
    pd = jnp.dot(xd, w_ih_d_ref[...],
                 preferred_element_type=jnp.float32) + b_d_ref[...]
    pd_scr[...] = pd.reshape(Tout, Bb, Hp)

    # ---- encoder recurrence: only h @ W_hh on the serial path ---------------
    h_scr[...] = jnp.zeros_like(h_scr)

    def enc_step(t, carry):
        h = h_scr[...]
        h_scr[...] = jnp.tanh(
            pe_scr[t]
            + jnp.dot(h.astype(jnp.bfloat16), w_hh_e,
                      preferred_element_type=jnp.float32))
        return carry

    lax.fori_loop(0, Tin, enc_step, 0, unroll=True)

    # ---- decoder recurrence (non-autoregressive over target covariates) -----
    def dec_step(t, carry):
        h = h_scr[...]
        h_new = jnp.tanh(
            pd_scr[t]
            + jnp.dot(h.astype(jnp.bfloat16), w_hh_d,
                      preferred_element_type=jnp.float32))
        h_scr[...] = h_new
        hh_scr[t] = h_new
        return carry

    lax.fori_loop(0, Tout, dec_step, 0, unroll=True)

    # ---- hoisted output head + fused RNNNLLNAR epilogue ----------------------
    # w_head columns are [w_mu, w_std, 0, w_std]; a per-lane select turns the
    # 4-lane head result into [mu, pred_d, pred_v, pred_std] in one pass and
    # the packed slab is stored once (no per-step masked stores).
    h_all = hh_scr[...].reshape(Tout * Bb, Hp).astype(jnp.bfloat16)
    o4 = (jnp.dot(h_all, w_head_ref[...], preferred_element_type=jnp.float32)
          + b_head_ref[...])                                   # (Tout*Bb, 4)
    sp = jnp.maximum(_softplus(o4), _STD_FLOOR)                # floored std > 0
    lane = lax.broadcasted_iota(jnp.int32, o4.shape, 1)
    packed = jnp.where(lane == 0, o4,                          # mu
             jnp.where(lane == 1, sp * sp,                     # pred_d = std**2
             jnp.where(lane == 2, 1e-9, sp)))                  # pred_v, pred_std
    out_ref[...] = packed.reshape(Tout, Bb, 4)


def init_params(key, feat_dim, hidden):
    """Deterministic synthetic base-model weights (f32, logical sizes)."""
    din_enc = 1 + feat_dim
    din_dec = feat_dim
    ks = jax.random.split(key, 6)

    def u(k, shape, fan_in):
        lim = 1.0 / jnp.sqrt(jnp.float32(fan_in))
        return jax.random.uniform(k, shape, jnp.float32, -lim, lim)

    return dict(
        w_ih_e=u(ks[0], (din_enc, hidden), din_enc),
        w_hh_e=u(ks[1], (hidden, hidden), hidden),
        b_e=jnp.zeros((1, hidden), jnp.float32),
        w_ih_d=u(ks[2], (din_dec, hidden), din_dec),
        w_hh_d=u(ks[3], (hidden, hidden), hidden),
        b_d=jnp.zeros((1, hidden), jnp.float32),
        w_out=u(ks[4], (hidden, 2), hidden),
        b_out=u(ks[5], (1, 2), hidden),
    )


@jax.jit
def _rnn_nar_forward(params, feats_in, inputs, feats_tgt):
    """Pallas-backed forward: returns (pred_mu, pred_d, pred_v, pred_std)."""
    B, Tin, F = feats_in.shape
    Tout = feats_tgt.shape[1]
    H = params["w_hh_e"].shape[0]
    De = 1 + F

    b_block = _SUBLANE                      # one sublane tile per batch block
    Bp = _round_up(B, b_block)
    Hp = _round_up(H, _LANE)

    # --- zero-pad weights to MXU/vreg-friendly shapes (numerically exact),
    #     cast matmul operands to bf16 (biases stay f32, added post-accum) -----
    bf16 = jnp.bfloat16
    w_ih_e = _pad_to(params["w_ih_e"], (De, Hp)).astype(bf16)
    w_hh_e = _pad_to(params["w_hh_e"], (Hp, Hp)).astype(bf16)
    b_e = _pad_to(params["b_e"], (1, Hp)).astype(jnp.float32)
    w_ih_d = _pad_to(params["w_ih_d"], (F, Hp)).astype(bf16)
    w_hh_d = _pad_to(params["w_hh_d"], (Hp, Hp)).astype(bf16)
    b_d = _pad_to(params["b_d"], (1, Hp)).astype(jnp.float32)

    # Packed head for the fused epilogue: columns [mu, std, 0, std].
    w_mu = params["w_out"][:, 0:1]
    w_sd = params["w_out"][:, 1:2]
    w_head = jnp.concatenate([w_mu, w_sd, jnp.zeros_like(w_mu), w_sd], axis=1)
    w_head = _pad_to(w_head, (Hp, 4)).astype(bf16)
    b_mu = params["b_out"][:, 0:1]
    b_sd = params["b_out"][:, 1:2]
    b_head = jnp.concatenate([b_mu, b_sd, jnp.zeros_like(b_mu), b_sd],
                             axis=1).astype(jnp.float32)

    # --- inputs: concat covariates, pad batch to sublane tile, time-major ----
    x_enc = jnp.concatenate([inputs, feats_in], axis=-1)              # (B,Tin,De)
    x_enc = _pad_to(x_enc.astype(jnp.float32), (Bp, Tin, De))
    x_dec = _pad_to(feats_tgt.astype(jnp.float32), (Bp, Tout, F))
    x_enc = jnp.transpose(x_enc, (1, 0, 2))                           # (Tin,Bp,De)
    x_dec = jnp.transpose(x_dec, (1, 0, 2))                           # (Tout,Bp,F)

    grid = (Bp // b_block,)

    packed = pl.pallas_call(
        _rnn_nar_kernel,
        out_shape=jax.ShapeDtypeStruct((Tout, Bp, 4), jnp.float32),
        grid_spec=pltpu.PrefetchScalarGridSpec(
            num_scalar_prefetch=0,
            grid=grid,
            in_specs=[
                pl.BlockSpec((Tin, b_block, De), lambda b: (0, b, 0)),
                pl.BlockSpec((Tout, b_block, F), lambda b: (0, b, 0)),
                pl.BlockSpec((De, Hp), lambda b: (0, 0)),
                pl.BlockSpec((Hp, Hp), lambda b: (0, 0)),
                pl.BlockSpec((1, Hp), lambda b: (0, 0)),
                pl.BlockSpec((F, Hp), lambda b: (0, 0)),
                pl.BlockSpec((Hp, Hp), lambda b: (0, 0)),
                pl.BlockSpec((1, Hp), lambda b: (0, 0)),
                pl.BlockSpec((Hp, 4), lambda b: (0, 0)),
                pl.BlockSpec((1, 4), lambda b: (0, 0)),
            ],
            out_specs=pl.BlockSpec((Tout, b_block, 4), lambda b: (0, b, 0)),
            scratch_shapes=[
                pltpu.VMEM((b_block, Hp), jnp.float32),         # hidden state
                pltpu.VMEM((Tin, b_block, Hp), jnp.float32),    # enc input proj
                pltpu.VMEM((Tout, b_block, Hp), jnp.float32),   # dec input proj
                pltpu.VMEM((Tout, b_block, Hp), jnp.float32),   # dec hidden hist
            ]),
        compiler_params=pltpu.CompilerParams(
            # batch blocks are independent -> split across TCs on v7x megacore
            dimension_semantics=("parallel",),
            # explicit headroom; safe on v5e/v6e (128 MiB) and v7x (64 MiB)
            vmem_limit_bytes=32 * 1024 * 1024),
    )(x_enc, x_dec, w_ih_e, w_hh_e, b_e, w_ih_d, w_hh_d, b_d, w_head, b_head)

    # one transpose of the packed slab, then cheap lane slices
    out_bm = jnp.transpose(packed, (1, 0, 2))[:B]    # (B, Tout, 4)
    pred_mu = out_bm[..., 0:1]
    pred_d = out_bm[..., 1:2]
    pred_v = out_bm[..., 2:3]
    pred_std = out_bm[..., 3:4]
    return pred_mu, pred_d, pred_v, pred_std


def _rnn_nar_reference(params, feats_in, inputs, feats_tgt):
    """Pure-JAX mirror of the kernel math (bf16 MXU operands, f32 accumulate)."""
    B, Tin, F = feats_in.shape
    Tout = feats_tgt.shape[1]
    H = params["w_hh_e"].shape[0]
    f32 = jnp.float32
    bf = lambda a: a.astype(jnp.bfloat16)

    x_enc = bf(jnp.concatenate([inputs, feats_in], axis=-1))
    x_dec = bf(feats_tgt)
    w_ih_e, w_hh_e = bf(params["w_ih_e"]), bf(params["w_hh_e"])
    w_ih_d, w_hh_d = bf(params["w_ih_d"]), bf(params["w_hh_d"])
    w_out = bf(params["w_out"])
    b_e, b_d, b_out = params["b_e"], params["b_d"], params["b_out"]

    pe = jnp.einsum("btd,dh->bth", x_enc, w_ih_e, preferred_element_type=f32) + b_e
    pd = jnp.einsum("btd,dh->bth", x_dec, w_ih_d, preferred_element_type=f32) + b_d

    h = jnp.zeros((B, H), f32)
    for t in range(Tin):
        h = jnp.tanh(pe[:, t] + jnp.dot(bf(h), w_hh_e, preferred_element_type=f32))
    mus, stds = [], []
    for t in range(Tout):
        h = jnp.tanh(pd[:, t] + jnp.dot(bf(h), w_hh_d, preferred_element_type=f32))
        o = jnp.dot(bf(h), w_out, preferred_element_type=f32) + b_out
        mus.append(o[:, 0:1])
        stds.append(jnp.maximum(_softplus(o[:, 1:2]), _STD_FLOOR))
    return jnp.stack(mus, axis=1), jnp.stack(stds, axis=1)


class RNNNLLNARPallas:
    """JAX/Pallas port of RNNNLLNAR (estimate_type='variance', not signature)."""

    def __init__(self, params):
        self.params = params
        self.estimate_type = "variance"
        self.is_signature = False

    def forward(self, dataset, norms=None, which_split="train"):
        inputs = dataset[0]      # (B, Tin, 1)
        feats_in = dataset[2]    # (B, Tin, F)
        feats_tgt = dataset[3]   # (B, Tout, F)
        _ids = dataset[4]        # only needed for the 'test' unnormalize path
        if which_split == "test":
            # TODO(synk): norms.unnormalize is an external stateful normalizer
            # object; only the non-test path is implemented.
            raise NotImplementedError
        # 'variance' branch of RNNNLLNAR.forward, with the d/v epilogue fused
        # into the Pallas kernel.
        return _rnn_nar_forward(self.params, feats_in, inputs, feats_tgt)

    __call__ = forward


if __name__ == "__main__":
    B, Tin, Tout, F, H = 2, 8, 8, 4, 32

    key = jax.random.PRNGKey(0)
    k_in, k_fi, k_ft, k_par = jax.random.split(key, 4)

    inputs = jax.random.normal(k_in, (B, Tin, 1), jnp.float32)
    feats_in = jax.random.normal(k_fi, (B, Tin, F), jnp.float32)
    feats_tgt = jax.random.normal(k_ft, (B, Tout, F), jnp.float32)
    ids = jnp.arange(B, dtype=jnp.int32)
    targets = jnp.zeros((B, Tout, 1), jnp.float32)  # dataset[1], unused here

    dataset = (inputs, targets, feats_in, feats_tgt, ids)

    model = RNNNLLNARPallas(init_params(k_par, F, H))
    pred_mu, pred_d, pred_v, pred_std = model(dataset, norms=None,
                                              which_split="train")
    jax.block_until_ready((pred_mu, pred_d, pred_v, pred_std))

    # shape / semantic invariants of the RNNNLLNAR 'variance' branch
    assert pred_mu.shape == (B, Tout, 1)
    assert pred_d.shape == (B, Tout, 1)
    assert pred_v.shape == (B, Tout, 1)
    assert pred_std.shape == (B, Tout, 1)
    assert bool(jnp.all(jnp.isfinite(pred_mu)))
    assert bool(jnp.all(pred_std > 0))
    assert bool(jnp.allclose(pred_d, pred_std ** 2))
    assert bool(jnp.allclose(pred_v, 1e-9))

    # numerical check against a pure-JAX mirror of the base model
    # (loose tolerance: bf16 MXU rounding + tanh approximation differences)
    ref_mu, ref_std = _rnn_nar_reference(model.params, feats_in, inputs, feats_tgt)
    assert bool(jnp.allclose(pred_mu, ref_mu, rtol=2e-2, atol=2e-2))
    assert bool(jnp.allclose(pred_std, ref_std, rtol=2e-2, atol=2e-2))

    print("KERNEL_OK")
</pallas_src>

<mosaic_0001>
module attributes {stable_mosaic.version = 11 : i64} {
  func.func @_rnn_nar_kernel(%arg0: i32, %arg1: memref<8x8x5xf32, #tpu.memory_space<vmem>>, %arg2: memref<8x8x4xf32, #tpu.memory_space<vmem>>, %arg3: memref<5x128xbf16, #tpu.memory_space<vmem>>, %arg4: memref<128x128xbf16, #tpu.memory_space<vmem>>, %arg5: memref<1x128xf32, #tpu.memory_space<vmem>>, %arg6: memref<4x128xbf16, #tpu.memory_space<vmem>>, %arg7: memref<128x128xbf16, #tpu.memory_space<vmem>>, %arg8: memref<1x128xf32, #tpu.memory_space<vmem>>, %arg9: memref<128x4xbf16, #tpu.memory_space<vmem>>, %arg10: memref<1x4xf32, #tpu.memory_space<vmem>>, %arg11: memref<8x8x4xf32, #tpu.memory_space<vmem>>, %arg12: memref<8x128xf32, #tpu.memory_space<vmem>>, %arg13: memref<8x8x128xf32, #tpu.memory_space<vmem>>, %arg14: memref<8x8x128xf32, #tpu.memory_space<vmem>>, %arg15: memref<8x8x128xf32, #tpu.memory_space<vmem>>) attributes {dimension_semantics = [#tpu.dimension_semantics<parallel>], iteration_bounds = array<i64: 1>, scalar_prefetch = 0 : i64, scratch_operands = 4 : i64, tpu.core_type = #tpu.core_type<tc>, window_params = [{transform_indices = @transform_0, window_bounds = array<i64: 8, 8, 5>}, {transform_indices = @transform_1, window_bounds = array<i64: 8, 8, 4>}, {pipeline_mode = #tpu.pipeline_mode<synchronous>, transform_indices = @transform_2, window_bounds = array<i64: 5, 128>}, {pipeline_mode = #tpu.pipeline_mode<synchronous>, transform_indices = @transform_3, window_bounds = array<i64: 128, 128>}, {pipeline_mode = #tpu.pipeline_mode<synchronous>, transform_indices = @transform_4, window_bounds = array<i64: 1, 128>}, {pipeline_mode = #tpu.pipeline_mode<synchronous>, transform_indices = @transform_5, window_bounds = array<i64: 4, 128>}, {pipeline_mode = #tpu.pipeline_mode<synchronous>, transform_indices = @transform_6, window_bounds = array<i64: 128, 128>}, {pipeline_mode = #tpu.pipeline_mode<synchronous>, transform_indices = @transform_7, window_bounds = array<i64: 1, 128>}, {pipeline_mode = #tpu.pipeline_mode<synchronous>, transform_indices = @transform_8, window_bounds = array<i64: 128, 4>}, {pipeline_mode = #tpu.pipeline_mode<synchronous>, transform_indices = @transform_9, window_bounds = array<i64: 1, 4>}, {transform_indices = @transform_10, window_bounds = array<i64: 8, 8, 4>}]} {
    %c0 = arith.constant 0 : index
    %c0_0 = arith.constant 0 : index
    %0 = vector.load %arg4[%c0, %c0_0] : memref<128x128xbf16, #tpu.memory_space<vmem>>, vector<128x128xbf16>
    %c0_1 = arith.constant 0 : index
    %c0_2 = arith.constant 0 : index
    %1 = vector.load %arg7[%c0_1, %c0_2] : memref<128x128xbf16, #tpu.memory_space<vmem>>, vector<128x128xbf16>
    %c0_3 = arith.constant 0 : index
    %c0_4 = arith.constant 0 : index
    %c0_5 = arith.constant 0 : index
    %2 = vector.load %arg1[%c0_3, %c0_4, %c0_5] : memref<8x8x5xf32, #tpu.memory_space<vmem>>, vector<8x8x5xf32>
    %3 = vector.shape_cast %2 : vector<8x8x5xf32> to vector<64x5xf32>
    %4 = arith.truncf %3 : vector<64x5xf32> to vector<64x5xbf16>
    %c0_6 = arith.constant 0 : index
    %c0_7 = arith.constant 0 : index
    %5 = vector.load %arg3[%c0_6, %c0_7] : memref<5x128xbf16, #tpu.memory_space<vmem>>, vector<5x128xbf16>
    %cst = arith.constant dense<0.000000e+00> : vector<64x128xf32>
    %6 = tpu.matmul %4, %5, %cst {dimension_numbers = #tpu.dot_dimension_numbers<[1], [0], [0], [1], [0, 0, 1, 1], [], []>} : vector<64x5xbf16>, vector<5x128xbf16>, vector<64x128xf32> -> vector<64x128xf32>
    %c0_8 = arith.constant 0 : index
    %c0_9 = arith.constant 0 : index
    %7 = vector.load %arg5[%c0_8, %c0_9] : memref<1x128xf32, #tpu.memory_space<vmem>>, vector<1x128xf32>
    %8 = vector.broadcast %7 : vector<1x128xf32> to vector<64x128xf32>
    %9 = arith.addf %6, %8 : vector<64x128xf32>
    %10 = vector.shape_cast %9 : vector<64x128xf32> to vector<8x8x128xf32>
    %c0_10 = arith.constant 0 : index
    %c0_11 = arith.constant 0 : index
    %c0_12 = arith.constant 0 : index
    %11 = vector.load %arg13[%c0_10, %c0_11, %c0_12] : memref<8x8x128xf32, #tpu.memory_space<vmem>>, vector<8x8x128xf32>
    tpu.vector_store %arg13[%c0_10, %c0_11, %c0_12], %10 {strides = array<i32>} : memref<8x8x128xf32, #tpu.memory_space<vmem>>, vector<8x8x128xf32>,
    %c0_13 = arith.constant 0 : index
    %c0_14 = arith.constant 0 : index
    %c0_15 = arith.constant 0 : index
    %12 = vector.load %arg2[%c0_13, %c0_14, %c0_15] : memref<8x8x4xf32, #tpu.memory_space<vmem>>, vector<8x8x4xf32>
    %13 = vector.shape_cast %12 : vector<8x8x4xf32> to vector<64x4xf32>
    %14 = arith.truncf %13 : vector<64x4xf32> to vector<64x4xbf16>
    %c0_16 = arith.constant 0 : index
    %c0_17 = arith.constant 0 : index
    %15 = vector.load %arg6[%c0_16, %c0_17] : memref<4x128xbf16, #tpu.memory_space<vmem>>, vector<4x128xbf16>
    %cst_18 = arith.constant dense<0.000000e+00> : vector<64x128xf32>
    %16 = tpu.matmul %14, %15, %cst_18 {dimension_numbers = #tpu.dot_dimension_numbers<[1], [0], [0], [1], [0, 0, 1, 1], [], []>} : vector<64x4xbf16>, vector<4x128xbf16>, vector<64x128xf32> -> vector<64x128xf32>
    %c0_19 = arith.constant 0 : index
    %c0_20 = arith.constant 0 : index
    %17 = vector.load %arg8[%c0_19, %c0_20] : memref<1x128xf32, #tpu.memory_space<vmem>>, vector<1x128xf32>
    %18 = vector.broadcast %17 : vector<1x128xf32> to vector<64x128xf32>
    %19 = arith.addf %16, %18 : vector<64x128xf32>
    %20 = vector.shape_cast %19 : vector<64x128xf32> to vector<8x8x128xf32>
    %c0_21 = arith.constant 0 : index
    %c0_22 = arith.constant 0 : index
    %c0_23 = arith.constant 0 : index
    %21 = vector.load %arg14[%c0_21, %c0_22, %c0_23] : memref<8x8x128xf32, #tpu.memory_space<vmem>>, vector<8x8x128xf32>
    tpu.vector_store %arg14[%c0_21, %c0_22, %c0_23], %20 {strides = array<i32>} : memref<8x8x128xf32, #tpu.memory_space<vmem>>, vector<8x8x128xf32>,
    %cst_24 = arith.constant 0.000000e+00 : f32
    %22 = vector.broadcast %cst_24 : f32 to vector<8x128xf32>
    %c0_25 = arith.constant 0 : index
    %c0_26 = arith.constant 0 : index
    %23 = vector.load %arg12[%c0_25, %c0_26] : memref<8x128xf32, #tpu.memory_space<vmem>>, vector<8x128xf32>
    tpu.vector_store %arg12[%c0_25, %c0_26], %22 {strides = array<i32>} : memref<8x128xf32, #tpu.memory_space<vmem>>, vector<8x128xf32>,
    %c0_i32 = arith.constant 0 : i32
    %c0_27 = arith.constant 0 : index
    %c0_28 = arith.constant 0 : index
    %24 = vector.load %arg12[%c0_27, %c0_28] : memref<8x128xf32, #tpu.memory_space<vmem>>, vector<8x128xf32>
    %25 = arith.index_cast %c0_i32 : i32 to index
    %c0_29 = arith.constant 0 : index
    %c0_30 = arith.constant 0 : index
    %26 = vector.load %arg13[%25, %c0_29, %c0_30] : memref<8x8x128xf32, #tpu.memory_space<vmem>>, vector<1x8x128xf32>
    %27 = vector.shape_cast %26 : vector<1x8x128xf32> to vector<8x128xf32>
    %28 = arith.truncf %24 : vector<8x128xf32> to vector<8x128xbf16>
    %cst_31 = arith.constant dense<0.000000e+00> : vector<8x128xf32>
    %29 = tpu.matmul %28, %0, %cst_31 {dimension_numbers = #tpu.dot_dimension_numbers<[1], [0], [0], [1], [0, 0, 1, 1], [], []>} : vector<8x128xbf16>, vector<128x128xbf16>, vector<8x128xf32> -> vector<8x128xf32>
    %30 = arith.addf %27, %29 : vector<8x128xf32>
    %31 = math.tanh %30 : vector<8x128xf32>
    %c0_32 = arith.constant 0 : index
    %c0_33 = arith.constant 0 : index
    %32 = vector.load %arg12[%c0_32, %c0_33] : memref<8x128xf32, #tpu.memory_space<vmem>>, vector<8x128xf32>
    tpu.vector_store %arg12[%c0_32, %c0_33], %31 {strides = array<i32>} : memref<8x128xf32, #tpu.memory_space<vmem>>, vector<8x128xf32>,
    %c1_i32 = arith.constant 1 : i32
    %c0_34 = arith.constant 0 : index
    %c0_35 = arith.constant 0 : index
    %33 = vector.load %arg12[%c0_34, %c0_35] : memref<8x128xf32, #tpu.memory_space<vmem>>, vector<8x128xf32>
    %34 = arith.index_cast %c1_i32 : i32 to index
    %c0_36 = arith.constant 0 : index
    %c0_37 = arith.constant 0 : index
    %35 = vector.load %arg13[%34, %c0_36, %c0_37] : memref<8x8x128xf32, #tpu.memory_space<vmem>>, vector<1x8x128xf32>
    %36 = vector.shape_cast %35 : vector<1x8x128xf32> to vector<8x128xf32>
    %37 = arith.truncf %33 : vector<8x128xf32> to vector<8x128xbf16>
    %cst_38 = arith.constant dense<0.000000e+00> : vector<8x128xf32>
    %38 = tpu.matmul %37, %0, %cst_38 {dimension_numbers = #tpu.dot_dimension_numbers<[1], [0], [0], [1], [0, 0, 1, 1], [], []>} : vector<8x128xbf16>, vector<128x128xbf16>, vector<8x128xf32> -> vector<8x128xf32>
    %39 = arith.addf %36, %38 : vector<8x128xf32>
    %40 = math.tanh %39 : vector<8x128xf32>
    %c0_39 = arith.constant 0 : index
    %c0_40 = arith.constant 0 : index
    %41 = vector.load %arg12[%c0_39, %c0_40] : memref<8x128xf32, #tpu.memory_space<vmem>>, vector<8x128xf32>
    tpu.vector_store %arg12[%c0_39, %c0_40], %40 {strides = array<i32>} : memref<8x128xf32, #tpu.memory_space<vmem>>, vector<8x128xf32>,
    %c2_i32 = arith.constant 2 : i32
    %c0_41 = arith.constant 0 : index
    %c0_42 = arith.constant 0 : index
    %42 = vector.load %arg12[%c0_41, %c0_42] : memref<8x128xf32, #tpu.memory_space<vmem>>, vector<8x128xf32>
    %43 = arith.index_cast %c2_i32 : i32 to index
    %c0_43 = arith.constant 0 : index
    %c0_44 = arith.constant 0 : index
    %44 = vector.load %arg13[%43, %c0_43, %c0_44] : memref<8x8x128xf32, #tpu.memory_space<vmem>>, vector<1x8x128xf32>
    %45 = vector.shape_cast %44 : vector<1x8x128xf32> to vector<8x128xf32>
    %46 = arith.truncf %42 : vector<8x128xf32> to vector<8x128xbf16>
    %cst_45 = arith.constant dense<0.000000e+00> : vector<8x128xf32>
    %47 = tpu.matmul %46, %0, %cst_45 {dimension_numbers = #tpu.dot_dimension_numbers<[1], [0], [0], [1], [0, 0, 1, 1], [], []>} : vector<8x128xbf16>, vector<128x128xbf16>, vector<8x128xf32> -> vector<8x128xf32>
    %48 = arith.addf %45, %47 : vector<8x128xf32>
    %49 = math.tanh %48 : vector<8x128xf32>
    %c0_46 = arith.constant 0 : index
    %c0_47 = arith.constant 0 : index
    %50 = vector.load %arg12[%c0_46, %c0_47] : memref<8x128xf32, #tpu.memory_space<vmem>>, vector<8x128xf32>
    tpu.vector_store %arg12[%c0_46, %c0_47], %49 {strides = array<i32>} : memref<8x128xf32, #tpu.memory_space<vmem>>, vector<8x128xf32>,
    %c3_i32 = arith.constant 3 : i32
    %c0_48 = arith.constant 0 : index
    %c0_49 = arith.constant 0 : index
    %51 = vector.load %arg12[%c0_48, %c0_49] : memref<8x128xf32, #tpu.memory_space<vmem>>, vector<8x128xf32>
    %52 = arith.index_cast %c3_i32 : i32 to index
    %c0_50 = arith.constant 0 : index
    %c0_51 = arith.constant 0 : index
    %53 = vector.load %arg13[%52, %c0_50, %c0_51] : memref<8x8x128xf32, #tpu.memory_space<vmem>>, vector<1x8x128xf32>
    %54 = vector.shape_cast %53 : vector<1x8x128xf32> to vector<8x128xf32>
    %55 = arith.truncf %51 : vector<8x128xf32> to vector<8x128xbf16>
    %cst_52 = arith.constant dense<0.000000e+00> : vector<8x128xf32>
    %56 = tpu.matmul %55, %0, %cst_52 {dimension_numbers = #tpu.dot_dimension_numbers<[1], [0], [0], [1], [0, 0, 1, 1], [], []>} : vector<8x128xbf16>, vector<128x128xbf16>, vector<8x128xf32> -> vector<8x128xf32>
    %57 = arith.addf %54, %56 : vector<8x128xf32>
    %58 = math.tanh %57 : vector<8x128xf32>
    %c0_53 = arith.constant 0 : index
    %c0_54 = arith.constant 0 : index
    %59 = vector.load %arg12[%c0_53, %c0_54] : memref<8x128xf32, #tpu.memory_space<vmem>>, vector<8x128xf32>
    tpu.vector_store %arg12[%c0_53, %c0_54], %58 {strides = array<i32>} : memref<8x128xf32, #tpu.memory_space<vmem>>, vector<8x128xf32>,
    %c4_i32 = arith.constant 4 : i32
    %c0_55 = arith.constant 0 : index
    %c0_56 = arith.constant 0 : index
    %60 = vector.load %arg12[%c0_55, %c0_56] : memref<8x128xf32, #tpu.memory_space<vmem>>, vector<8x128xf32>
    %61 = arith.index_cast %c4_i32 : i32 to index
    %c0_57 = arith.constant 0 : index
    %c0_58 = arith.constant 0 : index
    %62 = vector.load %arg13[%61, %c0_57, %c0_58] : memref<8x8x128xf32, #tpu.memory_space<vmem>>, vector<1x8x128xf32>
    %63 = vector.shape_cast %62 : vector<1x8x128xf32> to vector<8x128xf32>
    %64 = arith.truncf %60 : vector<8x128xf32> to vector<8x128xbf16>
    %cst_59 = arith.constant dense<0.000000e+00> : vector<8x128xf32>
    %65 = tpu.matmul %64, %0, %cst_59 {dimension_numbers = #tpu.dot_dimension_numbers<[1], [0], [0], [1], [0, 0, 1, 1], [], []>} : vector<8x128xbf16>, vector<128x128xbf16>, vector<8x128xf32> -> vector<8x128xf32>
    %66 = arith.addf %63, %65 : vector<8x128xf32>
    %67 = math.tanh %66 : vector<8x128xf32>
    %c0_60 = arith.constant 0 : index
    %c0_61 = arith.constant 0 : index
    %68 = vector.load %arg12[%c0_60, %c0_61] : memref<8x128xf32, #tpu.memory_space<vmem>>, vector<8x128xf32>
    tpu.vector_store %arg12[%c0_60, %c0_61], %67 {strides = array<i32>} : memref<8x128xf32, #tpu.memory_space<vmem>>, vector<8x128xf32>,
    %c5_i32 = arith.constant 5 : i32
    %c0_62 = arith.constant 0 : index
    %c0_63 = arith.constant 0 : index
    %69 = vector.load %arg12[%c0_62, %c0_63] : memref<8x128xf32, #tpu.memory_space<vmem>>, vector<8x128xf32>
    %70 = arith.index_cast %c5_i32 : i32 to index
    %c0_64 = arith.constant 0 : index
    %c0_65 = arith.constant 0 : index
    %71 = vector.load %arg13[%70, %c0_64, %c0_65] : memref<8x8x128xf32, #tpu.memory_space<vmem>>, vector<1x8x128xf32>
    %72 = vector.shape_cast %71 : vector<1x8x128xf32> to vector<8x128xf32>
    %73 = arith.truncf %69 : vector<8x128xf32> to vector<8x128xbf16>
    %cst_66 = arith.constant dense<0.000000e+00> : vector<8x128xf32>
    %74 = tpu.matmul %73, %0, %cst_66 {dimension_numbers = #tpu.dot_dimension_numbers<[1], [0], [0], [1], [0, 0, 1, 1], [], []>} : vector<8x128xbf16>, vector<128x128xbf16>, vector<8x128xf32> -> vector<8x128xf32>
    %75 = arith.addf %72, %74 : vector<8x128xf32>
    %76 = math.tanh %75 : vector<8x128xf32>
    %c0_67 = arith.constant 0 : index
    %c0_68 = arith.constant 0 : index
    %77 = vector.load %arg12[%c0_67, %c0_68] : memref<8x128xf32, #tpu.memory_space<vmem>>, vector<8x128xf32>
    tpu.vector_store %arg12[%c0_67, %c0_68], %76 {strides = array<i32>} : memref<8x128xf32, #tpu.memory_space<vmem>>, vector<8x128xf32>,
    %c6_i32 = arith.constant 6 : i32
    %c0_69 = arith.constant 0 : index
    %c0_70 = arith.constant 0 : index
    %78 = vector.load %arg12[%c0_69, %c0_70] : memref<8x128xf32, #tpu.memory_space<vmem>>, vector<8x128xf32>
    %79 = arith.index_cast %c6_i32 : i32 to index
    %c0_71 = arith.constant 0 : index
    %c0_72 = arith.constant 0 : index
    %80 = vector.load %arg13[%79, %c0_71, %c0_72] : memref<8x8x128xf32, #tpu.memory_space<vmem>>, vector<1x8x128xf32>
    %81 = vector.shape_cast %80 : vector<1x8x128xf32> to vector<8x128xf32>
    %82 = arith.truncf %78 : vector<8x128xf32> to vector<8x128xbf16>
    %cst_73 = arith.constant dense<0.000000e+00> : vector<8x128xf32>
    %83 = tpu.matmul %82, %0, %cst_73 {dimension_numbers = #tpu.dot_dimension_numbers<[1], [0], [0], [1], [0, 0, 1, 1], [], []>} : vector<8x128xbf16>, vector<128x128xbf16>, vector<8x128xf32> -> vector<8x128xf32>
    %84 = arith.addf %81, %83 : vector<8x128xf32>
    %85 = math.tanh %84 : vector<8x128xf32>
    %c0_74 = arith.constant 0 : index
    %c0_75 = arith.constant 0 : index
    %86 = vector.load %arg12[%c0_74, %c0_75] : memref<8x128xf32, #tpu.memory_space<vmem>>, vector<8x128xf32>
    tpu.vector_store %arg12[%c0_74, %c0_75], %85 {strides = array<i32>} : memref<8x128xf32, #tpu.memory_space<vmem>>, vector<8x128xf32>,
    %c7_i32 = arith.constant 7 : i32
    %c0_76 = arith.constant 0 : index
    %c0_77 = arith.constant 0 : index
    %87 = vector.load %arg12[%c0_76, %c0_77] : memref<8x128xf32, #tpu.memory_space<vmem>>, vector<8x128xf32>
    %88 = arith.index_cast %c7_i32 : i32 to index
    %c0_78 = arith.constant 0 : index
    %c0_79 = arith.constant 0 : index
    %89 = vector.load %arg13[%88, %c0_78, %c0_79] : memref<8x8x128xf32, #tpu.memory_space<vmem>>, vector<1x8x128xf32>
    %90 = vector.shape_cast %89 : vector<1x8x128xf32> to vector<8x128xf32>
    %91 = arith.truncf %87 : vector<8x128xf32> to vector<8x128xbf16>
    %cst_80 = arith.constant dense<0.000000e+00> : vector<8x128xf32>
    %92 = tpu.matmul %91, %0, %cst_80 {dimension_numbers = #tpu.dot_dimension_numbers<[1], [0], [0], [1], [0, 0, 1, 1], [], []>} : vector<8x128xbf16>, vector<128x128xbf16>, vector<8x128xf32> -> vector<8x128xf32>
    %93 = arith.addf %90, %92 : vector<8x128xf32>
    %94 = math.tanh %93 : vector<8x128xf32>
    %c0_81 = arith.constant 0 : index
    %c0_82 = arith.constant 0 : index
    %95 = vector.load %arg12[%c0_81, %c0_82] : memref<8x128xf32, #tpu.memory_space<vmem>>, vector<8x128xf32>
    tpu.vector_store %arg12[%c0_81, %c0_82], %94 {strides = array<i32>} : memref<8x128xf32, #tpu.memory_space<vmem>>, vector<8x128xf32>,
    %c8_i32 = arith.constant 8 : i32
    %c0_i32_83 = arith.constant 0 : i32
    %c0_84 = arith.constant 0 : index
    %c0_85 = arith.constant 0 : index
    %96 = vector.load %arg12[%c0_84, %c0_85] : memref<8x128xf32, #tpu.memory_space<vmem>>, vector<8x128xf32>
    %97 = arith.index_cast %c0_i32_83 : i32 to index
    %c0_86 = arith.constant 0 : index
    %c0_87 = arith.constant 0 : index
    %98 = vector.load %arg14[%97, %c0_86, %c0_87] : memref<8x8x128xf32, #tpu.memory_space<vmem>>, vector<1x8x128xf32>
    %99 = vector.shape_cast %98 : vector<1x8x128xf32> to vector<8x128xf32>
    %100 = arith.truncf %96 : vector<8x128xf32> to vector<8x128xbf16>
    %cst_88 = arith.constant dense<0.000000e+00> : vector<8x128xf32>
    %101 = tpu.matmul %100, %1, %cst_88 {dimension_numbers = #tpu.dot_dimension_numbers<[1], [0], [0], [1], [0, 0, 1, 1], [], []>} : vector<8x128xbf16>, vector<128x128xbf16>, vector<8x128xf32> -> vector<8x128xf32>
    %102 = arith.addf %99, %101 : vector<8x128xf32>
    %103 = math.tanh %102 : vector<8x128xf32>
    %c0_89 = arith.constant 0 : index
    %c0_90 = arith.constant 0 : index
    %104 = vector.load %arg12[%c0_89, %c0_90] : memref<8x128xf32, #tpu.memory_space<vmem>>, vector<8x128xf32>
    tpu.vector_store %arg12[%c0_89, %c0_90], %103 {strides = array<i32>} : memref<8x128xf32, #tpu.memory_space<vmem>>, vector<8x128xf32>,
    %105 = arith.index_cast %c0_i32_83 : i32 to index
    %c0_91 = arith.constant 0 : index
    %c0_92 = arith.constant 0 : index
    %106 = vector.load %arg15[%105, %c0_91, %c0_92] : memref<8x8x128xf32, #tpu.memory_space<vmem>>, vector<1x8x128xf32>
    %107 = vector.shape_cast %106 : vector<1x8x128xf32> to vector<8x128xf32>
    %108 = vector.shape_cast %103 : vector<8x128xf32> to vector<1x8x128xf32>
    tpu.vector_store %arg15[%105, %c0_91, %c0_92], %108 {strides = array<i32>} : memref<8x8x128xf32, #tpu.memory_space<vmem>>, vector<1x8x128xf32>,
    %c1_i32_93 = arith.constant 1 : i32
    %c0_94 = arith.constant 0 : index
    %c0_95 = arith.constant 0 : index
    %109 = vector.load %arg12[%c0_94, %c0_95] : memref<8x128xf32, #tpu.memory_space<vmem>>, vector<8x128xf32>
    %110 = arith.index_cast %c1_i32_93 : i32 to index
    %c0_96 = arith.constant 0 : index
    %c0_97 = arith.constant 0 : index
    %111 = vector.load %arg14[%110, %c0_96, %c0_97] : memref<8x8x128xf32, #tpu.memory_space<vmem>>, vector<1x8x128xf32>
    %112 = vector.shape_cast %111 : vector<1x8x128xf32> to vector<8x128xf32>
    %113 = arith.truncf %109 : vector<8x128xf32> to vector<8x128xbf16>
    %cst_98 = arith.constant dense<0.000000e+00> : vector<8x128xf32>
    %114 = tpu.matmul %113, %1, %cst_98 {dimension_numbers = #tpu.dot_dimension_numbers<[1], [0], [0], [1], [0, 0, 1, 1], [], []>} : vector<8x128xbf16>, vector<128x128xbf16>, vector<8x128xf32> -> vector<8x128xf32>
    %115 = arith.addf %112, %114 : vector<8x128xf32>
    %116 = math.tanh %115 : vector<8x128xf32>
    %c0_99 = arith.constant 0 : index
    %c0_100 = arith.constant 0 : index
    %117 = vector.load %arg12[%c0_99, %c0_100] : memref<8x128xf32, #tpu.memory_space<vmem>>, vector<8x128xf32>
    tpu.vector_store %arg12[%c0_99, %c0_100], %116 {strides = array<i32>} : memref<8x128xf32, #tpu.memory_space<vmem>>, vector<8x128xf32>,
    %118 = arith.index_cast %c1_i32_93 : i32 to index
    %c0_101 = arith.constant 0 : index
    %c0_102 = arith.constant 0 : index
    %119 = vector.load %arg15[%118, %c0_101, %c0_102] : memref<8x8x128xf32, #tpu.memory_space<vmem>>, vector<1x8x128xf32>
    %120 = vector.shape_cast %119 : vector<1x8x128xf32> to vector<8x128xf32>
    %121 = vector.shape_cast %116 : vector<8x128xf32> to vector<1x8x128xf32>
    tpu.vector_store %arg15[%118, %c0_101, %c0_102], %121 {strides = array<i32>} : memref<8x8x128xf32, #tpu.memory_space<vmem>>, vector<1x8x128xf32>,
    %c2_i32_103 = arith.constant 2 : i32
    %c0_104 = arith.constant 0 : index
    %c0_105 = arith.constant 0 : index
    %122 = vector.load %arg12[%c0_104, %c0_105] : memref<8x128xf32, #tpu.memory_space<vmem>>, vector<8x128xf32>
    %123 = arith.index_cast %c2_i32_103 : i32 to index
    %c0_106 = arith.constant 0 : index
    %c0_107 = arith.constant 0 : index
    %124 = vector.load %arg14[%123, %c0_106, %c0_107] : memref<8x8x128xf32, #tpu.memory_space<vmem>>, vector<1x8x128xf32>
    %125 = vector.shape_cast %124 : vector<1x8x128xf32> to vector<8x128xf32>
    %126 = arith.truncf %122 : vector<8x128xf32> to vector<8x128xbf16>
    %cst_108 = arith.constant dense<0.000000e+00> : vector<8x128xf32>
    %127 = tpu.matmul %126, %1, %cst_108 {dimension_numbers = #tpu.dot_dimension_numbers<[1], [0], [0], [1], [0, 0, 1, 1], [], []>} : vector<8x128xbf16>, vector<128x128xbf16>, vector<8x128xf32> -> vector<8x128xf32>
    %128 = arith.addf %125, %127 : vector<8x128xf32>
    %129 = math.tanh %128 : vector<8x128xf32>
    %c0_109 = arith.constant 0 : index
    %c0_110 = arith.constant 0 : index
    %130 = vector.load %arg12[%c0_109, %c0_110] : memref<8x128xf32, #tpu.memory_space<vmem>>, vector<8x128xf32>
    tpu.vector_store %arg12[%c0_109, %c0_110], %129 {strides = array<i32>} : memref<8x128xf32, #tpu.memory_space<vmem>>, vector<8x128xf32>,
    %131 = arith.index_cast %c2_i32_103 : i32 to index
    %c0_111 = arith.constant 0 : index
    %c0_112 = arith.constant 0 : index
    %132 = vector.load %arg15[%131, %c0_111, %c0_112] : memref<8x8x128xf32, #tpu.memory_space<vmem>>, vector<1x8x128xf32>
    %133 = vector.shape_cast %132 : vector<1x8x128xf32> to vector<8x128xf32>
    %134 = vector.shape_cast %129 : vector<8x128xf32> to vector<1x8x128xf32>
    tpu.vector_store %arg15[%131, %c0_111, %c0_112], %134 {strides = array<i32>} : memref<8x8x128xf32, #tpu.memory_space<vmem>>, vector<1x8x128xf32>,
    %c3_i32_113 = arith.constant 3 : i32
    %c0_114 = arith.constant 0 : index
    %c0_115 = arith.constant 0 : index
    %135 = vector.load %arg12[%c0_114, %c0_115] : memref<8x128xf32, #tpu.memory_space<vmem>>, vector<8x128xf32>
    %136 = arith.index_cast %c3_i32_113 : i32 to index
    %c0_116 = arith.constant 0 : index
    %c0_117 = arith.constant 0 : index
    %137 = vector.load %arg14[%136, %c0_116, %c0_117] : memref<8x8x128xf32, #tpu.memory_space<vmem>>, vector<1x8x128xf32>
    %138 = vector.shape_cast %137 : vector<1x8x128xf32> to vector<8x128xf32>
    %139 = arith.truncf %135 : vector<8x128xf32> to vector<8x128xbf16>
    %cst_118 = arith.constant dense<0.000000e+00> : vector<8x128xf32>
    %140 = tpu.matmul %139, %1, %cst_118 {dimension_numbers = #tpu.dot_dimension_numbers<[1], [0], [0], [1], [0, 0, 1, 1], [], []>} : vector<8x128xbf16>, vector<128x128xbf16>, vector<8x128xf32> -> vector<8x128xf32>
    %141 = arith.addf %138, %140 : vector<8x128xf32>
    %142 = math.tanh %141 : vector<8x128xf32>
    %c0_119 = arith.constant 0 : index
    %c0_120 = arith.constant 0 : index
    %143 = vector.load %arg12[%c0_119, %c0_120] : memref<8x128xf32, #tpu.memory_space<vmem>>, vector<8x128xf32>
    tpu.vector_store %arg12[%c0_119, %c0_120], %142 {strides = array<i32>} : memref<8x128xf32, #tpu.memory_space<vmem>>, vector<8x128xf32>,
    %144 = arith.index_cast %c3_i32_113 : i32 to index
    %c0_121 = arith.constant 0 : index
    %c0_122 = arith.constant 0 : index
    %145 = vector.load %arg15[%144, %c0_121, %c0_122] : memref<8x8x128xf32, #tpu.memory_space<vmem>>, vector<1x8x128xf32>
    %146 = vector.shape_cast %145 : vector<1x8x128xf32> to vector<8x128xf32>
    %147 = vector.shape_cast %142 : vector<8x128xf32> to vector<1x8x128xf32>
    tpu.vector_store %arg15[%144, %c0_121, %c0_122], %147 {strides = array<i32>} : memref<8x8x128xf32, #tpu.memory_space<vmem>>, vector<1x8x128xf32>,
    %c4_i32_123 = arith.constant 4 : i32
    %c0_124 = arith.constant 0 : index
    %c0_125 = arith.constant 0 : index
    %148 = vector.load %arg12[%c0_124, %c0_125] : memref<8x128xf32, #tpu.memory_space<vmem>>, vector<8x128xf32>
    %149 = arith.index_cast %c4_i32_123 : i32 to index
    %c0_126 = arith.constant 0 : index
    %c0_127 = arith.constant 0 : index
    %150 = vector.load %arg14[%149, %c0_126, %c0_127] : memref<8x8x128xf32, #tpu.memory_space<vmem>>, vector<1x8x128xf32>
    %151 = vector.shape_cast %150 : vector<1x8x128xf32> to vector<8x128xf32>
    %152 = arith.truncf %148 : vector<8x128xf32> to vector<8x128xbf16>
    %cst_128 = arith.constant dense<0.000000e+00> : vector<8x128xf32>
    %153 = tpu.matmul %152, %1, %cst_128 {dimension_numbers = #tpu.dot_dimension_numbers<[1], [0], [0], [1], [0, 0, 1, 1], [], []>} : vector<8x128xbf16>, vector<128x128xbf16>, vector<8x128xf32> -> vector<8x128xf32>
    %154 = arith.addf %151, %153 : vector<8x128xf32>
    %155 = math.tanh %154 : vector<8x128xf32>
    %c0_129 = arith.constant 0 : index
    %c0_130 = arith.constant 0 : index
    %156 = vector.load %arg12[%c0_129, %c0_130] : memref<8x128xf32, #tpu.memory_space<vmem>>, vector<8x128xf32>
    tpu.vector_store %arg12[%c0_129, %c0_130], %155 {strides = array<i32>} : memref<8x128xf32, #tpu.memory_space<vmem>>, vector<8x128xf32>,
    %157 = arith.index_cast %c4_i32_123 : i32 to index
    %c0_131 = arith.constant 0 : index
    %c0_132 = arith.constant 0 : index
    %158 = vector.load %arg15[%157, %c0_131, %c0_132] : memref<8x8x128xf32, #tpu.memory_space<vmem>>, vector<1x8x128xf32>
    %159 = vector.shape_cast %158 : vector<1x8x128xf32> to vector<8x128xf32>
    %160 = vector.shape_cast %155 : vector<8x128xf32> to vector<1x8x128xf32>
    tpu.vector_store %arg15[%157, %c0_131, %c0_132], %160 {strides = array<i32>} : memref<8x8x128xf32, #tpu.memory_space<vmem>>, vector<1x8x128xf32>,
    %c5_i32_133 = arith.constant 5 : i32
    %c0_134 = arith.constant 0 : index
    %c0_135 = arith.constant 0 : index
    %161 = vector.load %arg12[%c0_134, %c0_135] : memref<8x128xf32, #tpu.memory_space<vmem>>, vector<8x128xf32>
    %162 = arith.index_cast %c5_i32_133 : i32 to index
    %c0_136 = arith.constant 0 : index
    %c0_137 = arith.constant 0 : index
    %163 = vector.load %arg14[%162, %c0_136, %c0_137] : memref<8x8x128xf32, #tpu.memory_space<vmem>>, vector<1x8x128xf32>
    %164 = vector.shape_cast %163 : vector<1x8x128xf32> to vector<8x128xf32>
    %165 = arith.truncf %161 : vector<8x128xf32> to vector<8x128xbf16>
    %cst_138 = arith.constant dense<0.000000e+00> : vector<8x128xf32>
    %166 = tpu.matmul %165, %1, %cst_138 {dimension_numbers = #tpu.dot_dimension_numbers<[1], [0], [0], [1], [0, 0, 1, 1], [], []>} : vector<8x128xbf16>, vector<128x128xbf16>, vector<8x128xf32> -> vector<8x128xf32>
    %167 = arith.addf %164, %166 : vector<8x128xf32>
    %168 = math.tanh %167 : vector<8x128xf32>
    %c0_139 = arith.constant 0 : index
    %c0_140 = arith.constant 0 : index
    %169 = vector.load %arg12[%c0_139, %c0_140] : memref<8x128xf32, #tpu.memory_space<vmem>>, vector<8x128xf32>
    tpu.vector_store %arg12[%c0_139, %c0_140], %168 {strides = array<i32>} : memref<8x128xf32, #tpu.memory_space<vmem>>, vector<8x128xf32>,
    %170 = arith.index_cast %c5_i32_133 : i32 to index
    %c0_141 = arith.constant 0 : index
    %c0_142 = arith.constant 0 : index
    %171 = vector.load %arg15[%170, %c0_141, %c0_142] : memref<8x8x128xf32, #tpu.memory_space<vmem>>, vector<1x8x128xf32>
    %172 = vector.shape_cast %171 : vector<1x8x128xf32> to vector<8x128xf32>
    %173 = vector.shape_cast %168 : vector<8x128xf32> to vector<1x8x128xf32>
    tpu.vector_store %arg15[%170, %c0_141, %c0_142], %173 {strides = array<i32>} : memref<8x8x128xf32, #tpu.memory_space<vmem>>, vector<1x8x128xf32>,
    %c6_i32_143 = arith.constant 6 : i32
    %c0_144 = arith.constant 0 : index
    %c0_145 = arith.constant 0 : index
    %174 = vector.load %arg12[%c0_144, %c0_145] : memref<8x128xf32, #tpu.memory_space<vmem>>, vector<8x128xf32>
    %175 = arith.index_cast %c6_i32_143 : i32 to index
    %c0_146 = arith.constant 0 : index
    %c0_147 = arith.constant 0 : index
    %176 = vector.load %arg14[%175, %c0_146, %c0_147] : memref<8x8x128xf32, #tpu.memory_space<vmem>>, vector<1x8x128xf32>
    %177 = vector.shape_cast %176 : vector<1x8x128xf32> to vector<8x128xf32>
    %178 = arith.truncf %174 : vector<8x128xf32> to vector<8x128xbf16>
    %cst_148 = arith.constant dense<0.000000e+00> : vector<8x128xf32>
    %179 = tpu.matmul %178, %1, %cst_148 {dimension_numbers = #tpu.dot_dimension_numbers<[1], [0], [0], [1], [0, 0, 1, 1], [], []>} : vector<8x128xbf16>, vector<128x128xbf16>, vector<8x128xf32> -> vector<8x128xf32>
    %180 = arith.addf %177, %179 : vector<8x128xf32>
    %181 = math.tanh %180 : vector<8x128xf32>
    %c0_149 = arith.constant 0 : index
    %c0_150 = arith.constant 0 : index
    %182 = vector.load %arg12[%c0_149, %c0_150] : memref<8x128xf32, #tpu.memory_space<vmem>>, vector<8x128xf32>
    tpu.vector_store %arg12[%c0_149, %c0_150], %181 {strides = array<i32>} : memref<8x128xf32, #tpu.memory_space<vmem>>, vector<8x128xf32>,
    %183 = arith.index_cast %c6_i32_143 : i32 to index
    %c0_151 = arith.constant 0 : index
    %c0_152 = arith.constant 0 : index
    %184 = vector.load %arg15[%183, %c0_151, %c0_152] : memref<8x8x128xf32, #tpu.memory_space<vmem>>, vector<1x8x128xf32>
    %185 = vector.shape_cast %184 : vector<1x8x128xf32> to vector<8x128xf32>
    %186 = vector.shape_cast %181 : vector<8x128xf32> to vector<1x8x128xf32>
    tpu.vector_store %arg15[%183, %c0_151, %c0_152], %186 {strides = array<i32>} : memref<8x8x128xf32, #tpu.memory_space<vmem>>, vector<1x8x128xf32>,
    %c7_i32_153 = arith.constant 7 : i32
    %c0_154 = arith.constant 0 : index
    %c0_155 = arith.constant 0 : index
    %187 = vector.load %arg12[%c0_154, %c0_155] : memref<8x128xf32, #tpu.memory_space<vmem>>, vector<8x128xf32>
    %188 = arith.index_cast %c7_i32_153 : i32 to index
    %c0_156 = arith.constant 0 : index
    %c0_157 = arith.constant 0 : index
    %189 = vector.load %arg14[%188, %c0_156, %c0_157] : memref<8x8x128xf32, #tpu.memory_space<vmem>>, vector<1x8x128xf32>
    %190 = vector.shape_cast %189 : vector<1x8x128xf32> to vector<8x128xf32>
    %191 = arith.truncf %187 : vector<8x128xf32> to vector<8x128xbf16>
    %cst_158 = arith.constant dense<0.000000e+00> : vector<8x128xf32>
    %192 = tpu.matmul %191, %1, %cst_158 {dimension_numbers = #tpu.dot_dimension_numbers<[1], [0], [0], [1], [0, 0, 1, 1], [], []>} : vector<8x128xbf16>, vector<128x128xbf16>, vector<8x128xf32> -> vector<8x128xf32>
    %193 = arith.addf %190, %192 : vector<8x128xf32>
    %194 = math.tanh %193 : vector<8x128xf32>
    %c0_159 = arith.constant 0 : index
    %c0_160 = arith.constant 0 : index
    %195 = vector.load %arg12[%c0_159, %c0_160] : memref<8x128xf32, #tpu.memory_space<vmem>>, vector<8x128xf32>
    tpu.vector_store %arg12[%c0_159, %c0_160], %194 {strides = array<i32>} : memref<8x128xf32, #tpu.memory_space<vmem>>, vector<8x128xf32>,
    %196 = arith.index_cast %c7_i32_153 : i32 to index
    %c0_161 = arith.constant 0 : index
    %c0_162 = arith.constant 0 : index
    %197 = vector.load %arg15[%196, %c0_161, %c0_162] : memref<8x8x128xf32, #tpu.memory_space<vmem>>, vector<1x8x128xf32>
    %198 = vector.shape_cast %197 : vector<1x8x128xf32> to vector<8x128xf32>
    %199 = vector.shape_cast %194 : vector<8x128xf32> to vector<1x8x128xf32>
    tpu.vector_store %arg15[%196, %c0_161, %c0_162], %199 {strides = array<i32>} : memref<8x8x128xf32, #tpu.memory_space<vmem>>, vector<1x8x128xf32>,
    %c8_i32_163 = arith.constant 8 : i32
    %c0_164 = arith.constant 0 : index
    %c0_165 = arith.constant 0 : index
    %c0_166 = arith.constant 0 : index
    %200 = vector.load %arg15[%c0_164, %c0_165, %c0_166] : memref<8x8x128xf32, #tpu.memory_space<vmem>>, vector<8x8x128xf32>
    %201 = vector.shape_cast %200 : vector<8x8x128xf32> to vector<64x128xf32>
    %202 = arith.truncf %201 : vector<64x128xf32> to vector<64x128xbf16>
    %c0_167 = arith.constant 0 : index
    %c0_168 = arith.constant 0 : index
    %203 = vector.load %arg9[%c0_167, %c0_168] : memref<128x4xbf16, #tpu.memory_space<vmem>>, vector<128x4xbf16>
    %cst_169 = arith.constant dense<0.000000e+00> : vector<64x4xf32>
    %204 = tpu.matmul %202, %203, %cst_169 {dimension_numbers = #tpu.dot_dimension_numbers<[1], [0], [0], [1], [0, 0, 1, 1], [], []>} : vector<64x128xbf16>, vector<128x4xbf16>, vector<64x4xf32> -> vector<64x4xf32>
    %c0_170 = arith.constant 0 : index
    %c0_171 = arith.constant 0 : index
    %205 = vector.load %arg10[%c0_170, %c0_171] : memref<1x4xf32, #tpu.memory_space<vmem>>, vector<1x4xf32>
    %206 = vector.broadcast %205 : vector<1x4xf32> to vector<64x4xf32>
    %207 = arith.addf %204, %206 : vector<64x4xf32>
    %cst_172 = arith.constant 0.000000e+00 : f32
    %208 = vector.broadcast %cst_172 : f32 to vector<64x4xf32>
    %209 = arith.maximumf %207, %208 : vector<64x4xf32>
    %210 = math.absf %207 : vector<64x4xf32>
    %cst_173 = arith.constant 0.000000e+00 : f32
    %211 = vector.broadcast %cst_173 : f32 to vector<64x4xf32>
    %212 = arith.subf %211, %210 : vector<64x4xf32>
    %213 = math.exp %212 : vector<64x4xf32>
    %214 = math.log1p %213 : vector<64x4xf32>
    %215 = arith.addf %209, %214 : vector<64x4xf32>
    %cst_174 = arith.constant 9.99999993E-9 : f32
    %216 = vector.broadcast %cst_174 : f32 to vector<64x4xf32>
    %217 = arith.maximumf %215, %216 : vector<64x4xf32>
    %218 = tpu.iota {dimensions = array<i32: 1>} : vector<64x4xi32>
    %c0_i32_175 = arith.constant 0 : i32
    %219 = vector.broadcast %c0_i32_175 : i32 to vector<64x4xi32>
    %220 = arith.cmpi eq, %218, %219 : vector<64x4xi32>
    %c1_i32_176 = arith.constant 1 : i32
    %221 = vector.broadcast %c1_i32_176 : i32 to vector<64x4xi32>
    %222 = arith.cmpi eq, %218, %221 : vector<64x4xi32>
    %223 = arith.mulf %217, %217 : vector<64x4xf32>
    %c2_i32_177 = arith.constant 2 : i32
    %224 = vector.broadcast %c2_i32_177 : i32 to vector<64x4xi32>
    %225 = arith.cmpi eq, %218, %224 : vector<64x4xi32>
    %cst_178 = arith.constant 9.99999971E-10 : f32
    %226 = vector.broadcast %cst_178 : f32 to vector<64x4xf32>
    %227 = arith.select %225, %226, %217 : vector<64x4xi1>, vector<64x4xf32>
    %228 = arith.select %222, %223, %227 : vector<64x4xi1>, vector<64x4xf32>
    %229 = arith.select %220, %207, %228 : vector<64x4xi1>, vector<64x4xf32>
    %230 = vector.shape_cast %229 : vector<64x4xf32> to vector<8x8x4xf32>
    %c0_179 = arith.constant 0 : index
    %c0_180 = arith.constant 0 : index
    %c0_181 = arith.constant 0 : index
    %231 = vector.load %arg11[%c0_179, %c0_180, %c0_181] : memref<8x8x4xf32, #tpu.memory_space<vmem>>, vector<8x8x4xf32>
    tpu.vector_store %arg11[%c0_179, %c0_180, %c0_181], %230 {strides = array<i32>} : memref<8x8x4xf32, #tpu.memory_space<vmem>>, vector<8x8x4xf32>,
    return
  }
  func.func @transform_0(%arg0: i32) -> (i32, i32, i32) {
    %c0_i32 = arith.constant 0 : i32
    %c0_i32_0 = arith.constant 0 : i32
    %c0_i32_1 = arith.constant 0 : i32
    return %c0_i32, %arg0, %c0_i32_0 : i32, i32, i32
  }
  func.func @transform_1(%arg0: i32) -> (i32, i32, i32) {
    %c0_i32 = arith.constant 0 : i32
    %c0_i32_0 = arith.constant 0 : i32
    %c0_i32_1 = arith.constant 0 : i32
    return %c0_i32, %arg0, %c0_i32_0 : i32, i32, i32
  }
  func.func @transform_2(%arg0: i32) -> (i32, i32) {
    %c0_i32 = arith.constant 0 : i32
    %c0_i32_0 = arith.constant 0 : i32
    %c0_i32_1 = arith.constant 0 : i32
    return %c0_i32, %c0_i32_0 : i32, i32
  }
  func.func @transform_3(%arg0: i32) -> (i32, i32) {
    %c0_i32 = arith.constant 0 : i32
    %c0_i32_0 = arith.constant 0 : i32
    %c0_i32_1 = arith.constant 0 : i32
    return %c0_i32, %c0_i32_0 : i32, i32
  }
  func.func @transform_4(%arg0: i32) -> (i32, i32) {
    %c0_i32 = arith.constant 0 : i32
    %c0_i32_0 = arith.constant 0 : i32
    %c0_i32_1 = arith.constant 0 : i32
    return %c0_i32, %c0_i32_0 : i32, i32
  }
  func.func @transform_5(%arg0: i32) -> (i32, i32) {
    %c0_i32 = arith.constant 0 : i32
    %c0_i32_0 = arith.constant 0 : i32
    %c0_i32_1 = arith.constant 0 : i32
    return %c0_i32, %c0_i32_0 : i32, i32
  }
  func.func @transform_6(%arg0: i32) -> (i32, i32) {
    %c0_i32 = arith.constant 0 : i32
    %c0_i32_0 = arith.constant 0 : i32
    %c0_i32_1 = arith.constant 0 : i32
    return %c0_i32, %c0_i32_0 : i32, i32
  }
  func.func @transform_7(%arg0: i32) -> (i32, i32) {
    %c0_i32 = arith.constant 0 : i32
    %c0_i32_0 = arith.constant 0 : i32
    %c0_i32_1 = arith.constant 0 : i32
    return %c0_i32, %c0_i32_0 : i32, i32
  }
  func.func @transform_8(%arg0: i32) -> (i32, i32) {
    %c0_i32 = arith.constant 0 : i32
    %c0_i32_0 = arith.constant 0 : i32
    %c0_i32_1 = arith.constant 0 : i32
    return %c0_i32, %c0_i32_0 : i32, i32
  }
  func.func @transform_9(%arg0: i32) -> (i32, i32) {
    %c0_i32 = arith.constant 0 : i32
    %c0_i32_0 = arith.constant 0 : i32
    %c0_i32_1 = arith.constant 0 : i32
    return %c0_i32, %c0_i32_0 : i32, i32
  }
  func.func @transform_10(%arg0: i32) -> (i32, i32, i32) {
    %c0_i32 = arith.constant 0 : i32
    %c0_i32_0 = arith.constant 0 : i32
    %c0_i32_1 = arith.constant 0 : i32
    return %c0_i32, %arg0, %c0_i32_0 : i32, i32, i32
  }
}

</mosaic_0001>

<bundles_post_ra>
// kernel: _rnn_nar_forward.1
= control target key start
LH: loop header
LB: loop body
LE: loop exit
PB: predicated region body
PF: predicated region fallthrough
CT: control target
= control target key end

     0   :  { %vm101_vm0 = vcmask 1041408   ;;  %v2135_v0 = vmov 0.0   ;;  %vm102_vm1 = vcmask 1042432   ;;  %v2136_v2 = vmov 65535   ;;  %s2882_s3 = inlined_call_operand.vmem [shape: bf16[128,128], index: 3, kind: input, shape index: {}]   ;;  %s2883_s2 = inlined_call_operand.vmem [shape: bf16[5,128], index: 2, kind: input, shape index: {}]   ;;  %s2884_s0 = inlined_call_operand.vmem [shape: f32[8,8,5], index: 0, kind: input, shape index: {}]   ;;  %s2885_s5 = inlined_call_operand.vmem [shape: bf16[4,128], index: 5, kind: input, shape index: {}]   ;;  %s2886_s1 = inlined_call_operand.vmem [shape: f32[8,8,4], index: 1, kind: input, shape index: {}]   ;;  %s2887_s4 = inlined_call_operand.vmem [shape: f32[1,128], index: 4, kind: input, shape index: {}]   ;;  %s2888_s6 = inlined_call_operand.vmem [shape: bf16[128,128], index: 6, kind: input, shape index: {}]   ;;  %s2889_s7 = inlined_call_operand.vmem [shape: f32[1,128], index: 7, kind: input, shape index: {}]   ;;  %s2890_s8 = inlined_call_operand.vmem [shape: bf16[128,4], index: 8, kind: input, shape index: {}]   ;;  %s2891_s9 = inlined_call_operand.vmem [shape: f32[1,4], index: 9, kind: input, shape index: {}]   ;;  %s2892_s10 = inlined_call_operand.vmem [shape: f32[8,8,4], index: 10, kind: output, shape index: {}]  }
   0x1   :  { %1698 = vmatprep.subr.bf16.mxu1 %v2135_v0  ;;  %v2198_v1 = vld [vmem:[%s2882_s3] sm:$0xff]   ;;  %v103_v3 = vsel %vm101_vm0, 4294967295, %v2136_v2  ;;  %v2205_v4 = vld [vmem:[%s2882_s3 + $0x8] sm:$0xff]   ;;  %vm2137_vm2 = vmmov 0   ;;  %v2213_v6 = vld [vmem:[%s2882_s3 + $0x10] sm:$0xff]   ;;  %vm88_vm3 = vcmask 39936  }
   0x2   :  { %1699 = vmatpush3.bf16.msra.mxu1 %v2198_v1  ;;  %v104_v5 = vsel %vm102_vm1, %v103_v3, 0  ;;  %1714 = vmatprep.mubr.msk.bf16.mxu1 %vm2137_vm2, %v2135_v0  ;;  %v80_v7 = vld [vmem:[%s2883_s2] sm:$0x7]  ;;  %v69_v9 = vld [vmem:[%s2884_s0 + $0x8] sm:$0xff]  ;;  %v70_v12 = vld [vmem:[%s2884_s0 + $0x10] sm:$0xff]  ;;  %v2138_v20 = vmov 0.0|0.0  }
   0x3   :  { %1700 = vmatprep.subr.bf16.mxu1 %v2135_v0  ;;  %v68_v8 = vld [vmem:[%s2884_s0] sm:$0xff]  ;;  %v106_v10 = vand.u32 %v104_v5, %v80_v7  ;;  %v71_v13 = vld [vmem:[%s2884_s0 + $0x18] sm:$0xff]  ;;  %v2252_v17 = vld [vmem:[%s2882_s3 + $0x28] sm:$0xff]   ;;  %vm201_vm4 = vcmask 31744  }
   0x4   :  { %v76_v11 = vpack.c.bf16 %v69_v9, %v68_v8  ;;  %v77_v14 = vpack.c.bf16 %v71_v13, %v70_v12  ;;  %v2237_v15 = vld [vmem:[%s2882_s3 + $0x18] sm:$0xff]   ;;  %v2245_v16 = vld [vmem:[%s2882_s3 + $0x20] sm:$0xff]   ;;  %v2259_v18 = vld [vmem:[%s2882_s3 + $0x30] sm:$0xff]  }
   0x5   :  { %1678 = vmatprep.subr.bf16.mxu0 %v106_v10  ;;  %v2266_v19 = vld [vmem:[%s2882_s3 + $0x38] sm:$0xff]   ;;  %v72_v21 = vld [vmem:[%s2884_s0 + $0x20] sm:$0xff]  ;;  %v73_v22 = vld [vmem:[%s2884_s0 + $0x28] sm:$0xff] }
   0x6   :  { %1701 = vmatpush3.bf16.msra.mxu1 %v2205_v4  ;;  %1680 = vmatprep.mubr.msk.bf16.mxu0 %vm88_vm3, %v76_v11  ;;  %v74_v23 = vld [vmem:[%s2884_s0 + $0x30] sm:$0xff]  ;;  %v193_v24 = vld [vmem:[%s2885_s5] sm:$0x3]  ;;  %v78_v25 = vpack.c.bf16 %v73_v22, %v72_v21  ;;  %v75_v26 = vld [vmem:[%s2884_s0 + $0x38] sm:$0xff] }
   0x7   :  { %1702 = vmatprep.subr.bf16.mxu1 %v2135_v0  ;;  %1679 = vmatpush3.bf16.msra.mxu0 %v106_v10  ;;  %v181_v27 = vld [vmem:[%s2886_s1] sm:$0xff]  ;;  %v215_v28 = vsel %vm101_vm0, %v193_v24, 0  ;;  %v79_v29 = vpack.c.bf16 %v75_v26, %v74_v23  ;;  %v182_v30 = vld [vmem:[%s2886_s1 + $0x8] sm:$0xff]  ;;  %v183_v32 = vld [vmem:[%s2886_s1 + $0x10] sm:$0xff] }
   0x8   :  { %2042 = vmatprep.subr.msk.bf16.mxu0 %vm101_vm0, %v193_v24  ;;  %v189_v31 = vpack.c.bf16 %v182_v30, %v181_v27  ;;  %v184_v33 = vld [vmem:[%s2886_s1 + $0x18] sm:$0xff]  ;;  %v2346_v39 = vld [vmem:[%s2887_s4] ss:$0 sm:$0xff]  ;;  %v186_v49 = vld [vmem:[%s2886_s1 + $0x28] sm:$0xff] }
   0x9   :  { %v190_v34 = vpack.c.bf16 %v184_v33, %v183_v32  ;;  %v185_v48 = vld [vmem:[%s2886_s1 + $0x20] sm:$0xff]  ;;  %v187_v51 = vld [vmem:[%s2886_s1 + $0x30] sm:$0xff]  ;;  %v188_v52 = vld [vmem:[%s2886_s1 + $0x38] sm:$0xff] }
   0xa   :  { %1703 = vmatpush3.bf16.msra.mxu1 %v2213_v6  ;;  %1681 = vmatmul.mubr.msk.bf16.vlgmr.msra.gmra.mrb[0].mxu0 %vm88_vm3, %v77_v14  ;;  %v191_v50 = vpack.c.bf16 %v186_v49, %v185_v48  ;;  %v192_v53 = vpack.c.bf16 %v188_v52, %v187_v51 }
   0xb   :  { %1704 = vmatprep.subr.bf16.mxu1 %v2135_v0  ;;  %1689 = vmatpush3.bf16.msra.mxu0 %v215_v28 }
   0xc   :  { %1684 = vmatprep.mubr.msk.bf16.mxu0 %vm88_vm3, %v78_v25  ;;  %1738 = vmatprep.subr.bf16.mxu0 %v2135_v0 }
   0xe   :  { %1705 = vmatpush3.bf16.msra.mxu1 %v2237_v15 }
   0xf   :  { %1706 = vmatprep.subr.bf16.mxu1 %v2135_v0 }
  0x12   :  { %1707 = vmatpush3.bf16.msra.mxu1 %v2245_v16  ;;  %1685 = vmatmul.mubr.msk.bf16.gmra.mrb[4].mxu0 %vm88_vm3, %v79_v29 }
  0x13   :  { %1708 = vmatprep.subr.bf16.mxu1 %v2135_v0  ;;  %1690 = vmatprep.mubr.msk.bf16.mxu0 %vm201_vm4, %v189_v31 }
  0x16   :  { %1709 = vmatpush3.bf16.msra.mxu1 %v2252_v17 }
  0x17   :  { %1710 = vmatprep.subr.bf16.mxu1 %v2135_v0 }
  0x1a   :  { %1711 = vmatpush3.bf16.msra.mxu1 %v2259_v18  ;;  %1691 = vmatmul.mubr.msk.bf16.vlgmr.msra.gmra.mrb[8].mxu0 %vm201_vm4, %v190_v34 }
  0x1b   :  { %1712 = vmatprep.subr.bf16.mxu1 %v2135_v0  ;;  %1739 = vmatpush3.bf16.msra.mxu0 %v2198_v1 }
  0x1c   :  { %1740 = vmatprep.subr.bf16.mxu0 %v2135_v0  ;;  %1694 = vmatprep.mubr.msk.bf16.mxu0 %vm201_vm4, %v191_v50 }
  0x1e   :  { %1713 = vmatpush3.bf16.msra.mxu1 %v2266_v19 }
  0x1f   :  { %1718 = vmatprep.subr.bf16.mxu1 %v2135_v0  ;;  %1741 = vmatpush3.bf16.msra.mxu0 %v2205_v4 }
  0x20   :  { %1742 = vmatprep.subr.bf16.mxu0 %v2135_v0 }
  0x21   :  { %1715 = vmatmul.mubr.bf16.vlgmr.msra.gmra.mrb[0].mxu1 %v2138_v20 }
  0x22   :  { %1719 = vmatpush3.bf16.msra.mxu1 %v2198_v1  ;;  %1734 = vmatprep.mubr.msk.bf16.mxu1 %vm2137_vm2, %v2135_v0 }
  0x23   :  { %1720 = vmatprep.subr.bf16.mxu1 %v2135_v0  ;;  %1743 = vmatpush3.bf16.msra.mxu0 %v2213_v6 }
  0x24   :  { %1744 = vmatprep.subr.bf16.mxu0 %v2135_v0  ;;  %1695 = vmatmul.mubr.msk.bf16.gmra.mrb[12].mxu0 %vm201_vm4, %v192_v53 }
  0x25   :  { %1754 = vmatprep.mubr.msk.bf16.mxu0 %vm2137_vm2, %v2135_v0 }
  0x26   :  { %1721 = vmatpush3.bf16.msra.mxu1 %v2205_v4 }
  0x27   :  { %1722 = vmatprep.subr.bf16.mxu1 %v2135_v0  ;;  %1745 = vmatpush3.bf16.msra.mxu0 %v2237_v15 }
  0x28   :  { %1746 = vmatprep.subr.bf16.mxu0 %v2135_v0 }
  0x2a   :  { %1723 = vmatpush3.bf16.msra.mxu1 %v2213_v6 }
  0x2b   :  { %1724 = vmatprep.subr.bf16.mxu1 %v2135_v0  ;;  %1747 = vmatpush3.bf16.msra.mxu0 %v2245_v16 }
  0x2c   :  { %1748 = vmatprep.subr.bf16.mxu0 %v2135_v0 }
  0x2e   :  { %1725 = vmatpush3.bf16.msra.mxu1 %v2237_v15 }
  0x2f   :  { %1726 = vmatprep.subr.bf16.mxu1 %v2135_v0  ;;  %1749 = vmatpush3.bf16.msra.mxu0 %v2252_v17 }
  0x30   :  { %1750 = vmatprep.subr.bf16.mxu0 %v2135_v0 }
  0x32   :  { %1727 = vmatpush3.bf16.msra.mxu1 %v2245_v16 }
  0x33   :  { %1728 = vmatprep.subr.bf16.mxu1 %v2135_v0  ;;  %1751 = vmatpush3.bf16.msra.mxu0 %v2259_v18 }
  0x34   :  { %1752 = vmatprep.subr.bf16.mxu0 %v2135_v0 }
  0x36   :  { %1729 = vmatpush3.bf16.msra.mxu1 %v2252_v17 }
  0x37   :  { %1730 = vmatprep.subr.bf16.mxu1 %v2135_v0  ;;  %1753 = vmatpush3.bf16.msra.mxu0 %v2266_v19 }
  0x38   :  { %1778 = vmatprep.subr.bf16.mxu0 %v2135_v0 }
  0x3a   :  { %1731 = vmatpush3.bf16.msra.mxu1 %v2259_v18 }
  0x3b   :  { %1732 = vmatprep.subr.bf16.mxu1 %v2135_v0 }
  0x3e   :  { %1733 = vmatpush3.bf16.msra.mxu1 %v2266_v19 }
  0x3f   :  { %1758 = vmatprep.subr.bf16.mxu1 %v2135_v0 }
  0xdd   :  { %v2339_v35 = vpop.f32.mrb[0].mxu0 }
  0xde   :  { %v142_v36 = vpop.f32.mrb[1].mxu0  ;;  %v151_v14 = vadd.f32 %v2339_v35, %v2346_v39 }
  0xdf   :  { %v2341_v37 = vpop.f32.mrb[2].mxu0  ;;  %v143_v40 = vadd.f32 %v2346_v39, %v142_v36 }
  0xe0   :  { %v145_v38 = vpop.f32.mrb[3].mxu0  ;;  %v154_v27 = vadd.f32 %v2341_v37, %v2346_v39 }
  0xe1   :  { %v146_v62 = vadd.f32 %v2346_v39, %v145_v38 }
  0xe5   :  { %v2383_v54 = vpop.f32.mrb[4].mxu0 }
  0xe6   :  { %v2385_v55 = vpop.f32.mrb[5].mxu0  ;;  %v167_v48 = vadd.f32 %v2383_v54, %v2346_v39  ;;  %v2533_v54 = vld [vmem:[%s2888_s6 + $0x20] sm:$0xff]  }
  0xe7   :  { %v2387_v56 = vpop.f32.mrb[6].mxu0  ;;  %v159_v35 = vadd.f32 %v2346_v39, %v2385_v55 }
  0xe8   :  { %v2389_v57 = vpop.f32.mrb[7].mxu0 }
  0xed   :  { %v2391_v58 = vpop.f32.mrb[8].mxu0 }
  0xee   :  { %v2393_v59 = vpop.f32.mrb[9].mxu0 }
  0xef   :  { %v2395_v60 = vpop.f32.mrb[10].mxu0 }
  0xf0   :  { %v2397_v61 = vpop.f32.mrb[11].mxu0 }
  0xf4   :  { %v376_v41 = vpop.f32.mrb[0].mxu1 }
  0xf5   :  { %v382_v42 = vadd.f32 %v376_v41, %v143_v40  ;;  %v1716_v43 = vpop.f32.mrb[1].mxu1 }
  0xf6   :  { %v379_v44 = vpop.f32.mrb[2].mxu1 }
  0xf7   :  { %2071 = vtanh.f32 %v382_v42  ;;  %v1717_v45 = vpop.f32.mrb[3].mxu1  ;;  %v2418_v10 = vpop.f32.mrb[12].mxu0 }
  0xf8   :  { %v2420_v11 = vpop.f32.mrb[13].mxu0 }
  0xf9   :  { %v2422_v12 = vpop.f32.mrb[14].mxu0 }
  0xfa   :  { %v2424_v13 = vpop.f32.mrb[15].mxu0 }
 0x101   :  { %v2072_v46 = vpop.eup %2071 }
 0x102   :  { %v388_v47 = vpack.c.bf16 %v2072_v46, %v2072_v46  ;;  %v2506_v46 = vld [vmem:[%s2888_s6 + $0x10] sm:$0xff]  }
 0x104   :  { %1735 = vmatmul.mubr.bf16.vlgmr.msra.gmra.mrb[4].mxu1 %v388_v47  ;;  %v2513_v47 = vld [vmem:[%s2888_s6 + $0x18] sm:$0xff]  }
 0x105   :  { %1759 = vmatpush3.bf16.msra.mxu1 %v2198_v1  ;;  %1774 = vmatprep.mubr.msk.bf16.mxu1 %vm2137_vm2, %v2135_v0 }
 0x106   :  { %1760 = vmatprep.subr.bf16.mxu1 %v2135_v0 }
 0x109   :  { %1761 = vmatpush3.bf16.msra.mxu1 %v2205_v4 }
 0x10a   :  { %1762 = vmatprep.subr.bf16.mxu1 %v2135_v0 }
 0x10d   :  { %1763 = vmatpush3.bf16.msra.mxu1 %v2213_v6 }
 0x10e   :  { %1764 = vmatprep.subr.bf16.mxu1 %v2135_v0 }
 0x111   :  { %1765 = vmatpush3.bf16.msra.mxu1 %v2237_v15 }
 0x112   :  { %1766 = vmatprep.subr.bf16.mxu1 %v2135_v0 }
 0x115   :  { %1767 = vmatpush3.bf16.msra.mxu1 %v2245_v16 }
 0x116   :  { %1768 = vmatprep.subr.bf16.mxu1 %v2135_v0 }
 0x119   :  { %1769 = vmatpush3.bf16.msra.mxu1 %v2252_v17 }
 0x11a   :  { %1770 = vmatprep.subr.bf16.mxu1 %v2135_v0 }
 0x11d   :  { %1771 = vmatpush3.bf16.msra.mxu1 %v2259_v18 }
 0x11e   :  { %1772 = vmatprep.subr.bf16.mxu1 %v2135_v0 }
 0x121   :  { %1773 = vmatpush3.bf16.msra.mxu1 %v2266_v19 }
 0x122   :  { %1798 = vmatprep.subr.bf16.mxu1 %v2135_v0 }
 0x1d7   :  { %v423_v63 = vpop.f32.mrb[4].mxu1 }
 0x1d8   :  { %v429_v2 = vadd.f32 %v423_v63, %v146_v62  ;;  %v1736_v3 = vpop.f32.mrb[5].mxu1  ;;  %v2542_v62 = vld [vmem:[%s2888_s6 + $0x28] sm:$0xff]   ;;  %v2551_v63 = vld [vmem:[%s2888_s6 + $0x30] sm:$0xff]  }
 0x1d9   :  { %v426_v5 = vpop.f32.mrb[6].mxu1  ;;  %v170_v3 = vadd.f32 %v2387_v56, %v2346_v39 }
 0x1da   :  { %2073 = vtanh.f32 %v429_v2  ;;  %v1737_v7 = vpop.f32.mrb[7].mxu1  ;;  %v2560_v2 = vld [vmem:[%s2888_s6 + $0x38] sm:$0xff]  }
 0x1e4   :  { %v2074_v8 = vpop.eup %2073 }
 0x1e5   :  { %v435_v9 = vpack.c.bf16 %v2074_v8, %v2074_v8 }
 0x1e7   :  { %1755 = vmatmul.mubr.bf16.vlgmr.msra.gmra.mrb[16].mxu0 %v435_v9 }
 0x1e8   :  { %1779 = vmatpush3.bf16.msra.mxu0 %v2198_v1  ;;  %1794 = vmatprep.mubr.msk.bf16.mxu0 %vm2137_vm2, %v2135_v0 }
 0x1e9   :  { %1780 = vmatprep.subr.bf16.mxu0 %v2135_v0 }
 0x1ec   :  { %1781 = vmatpush3.bf16.msra.mxu0 %v2205_v4 }
 0x1ed   :  { %1782 = vmatprep.subr.bf16.mxu0 %v2135_v0 }
 0x1f0   :  { %1783 = vmatpush3.bf16.msra.mxu0 %v2213_v6 }
 0x1f1   :  { %1784 = vmatprep.subr.bf16.mxu0 %v2135_v0 }
 0x1f4   :  { %1785 = vmatpush3.bf16.msra.mxu0 %v2237_v15 }
 0x1f5   :  { %1786 = vmatprep.subr.bf16.mxu0 %v2135_v0 }
 0x1f8   :  { %1787 = vmatpush3.bf16.msra.mxu0 %v2245_v16 }
 0x1f9   :  { %1788 = vmatprep.subr.bf16.mxu0 %v2135_v0 }
 0x1fc   :  { %1789 = vmatpush3.bf16.msra.mxu0 %v2252_v17 }
 0x1fd   :  { %1790 = vmatprep.subr.bf16.mxu0 %v2135_v0 }
 0x200   :  { %1791 = vmatpush3.bf16.msra.mxu0 %v2259_v18 }
 0x201   :  { %1792 = vmatprep.subr.bf16.mxu0 %v2135_v0 }
 0x204   :  { %1793 = vmatpush3.bf16.msra.mxu0 %v2266_v19 }
 0x205   :  { %1818 = vmatprep.subr.bf16.mxu0 %v2135_v0 }
 0x2ba   :  { %v470_v20 = vpop.f32.mrb[16].mxu0 }
 0x2bb   :  { %v476_v21 = vadd.f32 %v470_v20, %v151_v14  ;;  %v1756_v22 = vpop.f32.mrb[17].mxu0 }
 0x2bc   :  { %v473_v23 = vpop.f32.mrb[18].mxu0 }
 0x2bd   :  { %2075 = vtanh.f32 %v476_v21  ;;  %v1757_v24 = vpop.f32.mrb[19].mxu0 }
 0x2c7   :  { %v2076_v25 = vpop.eup %2075 }
 0x2c8   :  { %v482_v26 = vpack.c.bf16 %v2076_v25, %v2076_v25 }
 0x2ca   :  { %1775 = vmatmul.mubr.bf16.vlgmr.msra.gmra.mrb[8].mxu1 %v482_v26 }
 0x2cb   :  { %1799 = vmatpush3.bf16.msra.mxu1 %v2198_v1  ;;  %1814 = vmatprep.mubr.msk.bf16.mxu1 %vm2137_vm2, %v2135_v0 }
 0x2cc   :  { %1800 = vmatprep.subr.bf16.mxu1 %v2135_v0 }
 0x2cf   :  { %1801 = vmatpush3.bf16.msra.mxu1 %v2205_v4 }
 0x2d0   :  { %1802 = vmatprep.subr.bf16.mxu1 %v2135_v0 }
 0x2d3   :  { %1803 = vmatpush3.bf16.msra.mxu1 %v2213_v6 }
 0x2d4   :  { %1804 = vmatprep.subr.bf16.mxu1 %v2135_v0 }
 0x2d7   :  { %1805 = vmatpush3.bf16.msra.mxu1 %v2237_v15 }
 0x2d8   :  { %1806 = vmatprep.subr.bf16.mxu1 %v2135_v0 }
 0x2db   :  { %1807 = vmatpush3.bf16.msra.mxu1 %v2245_v16 }
 0x2dc   :  { %1808 = vmatprep.subr.bf16.mxu1 %v2135_v0 }
 0x2df   :  { %1809 = vmatpush3.bf16.msra.mxu1 %v2252_v17 }
 0x2e0   :  { %1810 = vmatprep.subr.bf16.mxu1 %v2135_v0 }
 0x2e3   :  { %1811 = vmatpush3.bf16.msra.mxu1 %v2259_v18 }
 0x2e4   :  { %1812 = vmatprep.subr.bf16.mxu1 %v2135_v0 }
 0x2e7   :  { %1813 = vmatpush3.bf16.msra.mxu1 %v2266_v19 }
 0x2e8   :  { %1838 = vmatprep.subr.bf16.mxu1 %v2135_v0 }
 0x39d   :  { %v517_v28 = vpop.f32.mrb[8].mxu1 }
 0x39e   :  { %v523_v29 = vadd.f32 %v517_v28, %v154_v27  ;;  %v1776_v30 = vpop.f32.mrb[9].mxu1 }
 0x39f   :  { %v520_v31 = vpop.f32.mrb[10].mxu1 }
 0x3a0   :  { %2077 = vtanh.f32 %v523_v29  ;;  %v1777_v32 = vpop.f32.mrb[11].mxu1 }
 0x3aa   :  { %v2078_v33 = vpop.eup %2077 }
 0x3ab   :  { %v529_v34 = vpack.c.bf16 %v2078_v33, %v2078_v33 }
 0x3ad   :  { %1795 = vmatmul.mubr.bf16.vlgmr.msra.gmra.mrb[20].mxu0 %v529_v34 }
 0x3ae   :  { %1819 = vmatpush3.bf16.msra.mxu0 %v2198_v1  ;;  %1834 = vmatprep.mubr.msk.bf16.mxu0 %vm2137_vm2, %v2135_v0 }
 0x3af   :  { %1820 = vmatprep.subr.bf16.mxu0 %v2135_v0 }
 0x3b2   :  { %1821 = vmatpush3.bf16.msra.mxu0 %v2205_v4 }
 0x3b3   :  { %1822 = vmatprep.subr.bf16.mxu0 %v2135_v0 }
 0x3b6   :  { %1823 = vmatpush3.bf16.msra.mxu0 %v2213_v6 }
 0x3b7   :  { %1824 = vmatprep.subr.bf16.mxu0 %v2135_v0 }
 0x3ba   :  { %1825 = vmatpush3.bf16.msra.mxu0 %v2237_v15 }
 0x3bb   :  { %1826 = vmatprep.subr.bf16.mxu0 %v2135_v0 }
 0x3be   :  { %1827 = vmatpush3.bf16.msra.mxu0 %v2245_v16 }
 0x3bf   :  { %1828 = vmatprep.subr.bf16.mxu0 %v2135_v0 }
 0x3c2   :  { %1829 = vmatpush3.bf16.msra.mxu0 %v2252_v17 }
 0x3c3   :  { %1830 = vmatprep.subr.bf16.mxu0 %v2135_v0 }
 0x3c6   :  { %1831 = vmatpush3.bf16.msra.mxu0 %v2259_v18 }
 0x3c7   :  { %1832 = vmatprep.subr.bf16.mxu0 %v2135_v0 }
 0x3ca   :  { %1833 = vmatpush3.bf16.msra.mxu0 %v2266_v19 }
 0x3cb   :  { %1858 = vmatprep.subr.bf16.mxu0 %v2135_v0 }
 0x480   :  { %v564_v36 = vpop.f32.mrb[20].mxu0 }
 0x481   :  { %v570_v37 = vadd.f32 %v564_v36, %v159_v35  ;;  %v1796_v38 = vpop.f32.mrb[21].mxu0 }
 0x482   :  { %v567_v40 = vpop.f32.mrb[22].mxu0 }
 0x483   :  { %2079 = vtanh.f32 %v570_v37  ;;  %v1797_v41 = vpop.f32.mrb[23].mxu0 }
 0x48d   :  { %v2080_v42 = vpop.eup %2079 }
 0x48e   :  { %v576_v43 = vpack.c.bf16 %v2080_v42, %v2080_v42 }
 0x490   :  { %1815 = vmatmul.mubr.bf16.vlgmr.msra.gmra.mrb[12].mxu1 %v576_v43 }
 0x491   :  { %1839 = vmatpush3.bf16.msra.mxu1 %v2198_v1  ;;  %1854 = vmatprep.mubr.msk.bf16.mxu1 %vm2137_vm2, %v2135_v0  ;;  %v162_v1 = vadd.f32 %v2346_v39, %v2389_v57  ;;  %v2589_v39 = vld [vmem:[%s2889_s7] ss:$0 sm:$0xff] }
 0x492   :  { %1840 = vmatprep.subr.bf16.mxu1 %v2135_v0  ;;  %v252_v56 = vadd.f32 %v2589_v39, %v2393_v59  ;;  %v255_v59 = vadd.f32 %v2589_v39, %v2397_v61  ;;  %v260_v61 = vadd.f32 %v2391_v58, %v2589_v39  ;;  %v263_v58 = vadd.f32 %v2395_v60, %v2589_v39 }
 0x493   :  { %v268_v60 = vadd.f32 %v2589_v39, %v2420_v11  ;;  %v2063_v11 = vld [vmem:[%s2890_s8] sm:$0xff]  }
 0x495   :  { %1841 = vmatpush3.bf16.msra.mxu1 %v2205_v4 }
 0x496   :  { %1842 = vmatprep.subr.bf16.mxu1 %v2135_v0 }
 0x499   :  { %1843 = vmatpush3.bf16.msra.mxu1 %v2213_v6 }
 0x49a   :  { %1844 = vmatprep.subr.bf16.mxu1 %v2135_v0 }
 0x49d   :  { %1845 = vmatpush3.bf16.msra.mxu1 %v2237_v15 }
 0x49e   :  { %1846 = vmatprep.subr.bf16.mxu1 %v2135_v0 }
 0x4a1   :  { %1847 = vmatpush3.bf16.msra.mxu1 %v2245_v16 }
 0x4a2   :  { %1848 = vmatprep.subr.bf16.mxu1 %v2135_v0 }
 0x4a5   :  { %1849 = vmatpush3.bf16.msra.mxu1 %v2252_v17 }
 0x4a6   :  { %1850 = vmatprep.subr.bf16.mxu1 %v2135_v0 }
 0x4a9   :  { %1851 = vmatpush3.bf16.msra.mxu1 %v2259_v18  ;;  %v2493_v18 = vld [vmem:[%s2888_s6] sm:$0xff]  }
 0x4aa   :  { %1852 = vmatprep.subr.bf16.mxu1 %v2135_v0 }
 0x4ad   :  { %1853 = vmatpush3.bf16.msra.mxu1 %v2266_v19  ;;  %v2499_v19 = vld [vmem:[%s2888_s6 + $0x8] sm:$0xff]  }
 0x4ae   :  { %1878 = vmatprep.subr.bf16.mxu1 %v2135_v0 }
 0x563   :  { %v611_v4 = vpop.f32.mrb[12].mxu1 }
 0x564   :  { %v617_v6 = vadd.f32 %v611_v4, %v162_v1  ;;  %v1816_v15 = vpop.f32.mrb[13].mxu1 }
 0x565   :  { %v614_v16 = vpop.f32.mrb[14].mxu1 }
 0x566   :  { %2081 = vtanh.f32 %v617_v6  ;;  %v1817_v44 = vpop.f32.mrb[15].mxu1 }
 0x570   :  { %v2082_v17 = vpop.eup %2081 }
 0x571   :  { %v623_v45 = vpack.c.bf16 %v2082_v17, %v2082_v17 }
 0x573   :  { %1835 = vmatmul.mubr.bf16.vlgmr.msra.gmra.mrb[24].mxu0 %v623_v45 }
 0x574   :  { %1874 = vmatprep.mubr.msk.bf16.mxu0 %vm2137_vm2, %v2135_v0  ;;  %1859 = vmatpush3.bf16.msra.mxu0 %v2493_v18 }
 0x575   :  { %1860 = vmatprep.subr.bf16.mxu0 %v2135_v0 }
 0x578   :  { %1861 = vmatpush3.bf16.msra.mxu0 %v2499_v19 }
 0x579   :  { %1862 = vmatprep.subr.bf16.mxu0 %v2135_v0 }
 0x57c   :  { %1863 = vmatpush3.bf16.msra.mxu0 %v2506_v46 }
 0x57d   :  { %1864 = vmatprep.subr.bf16.mxu0 %v2135_v0 }
 0x580   :  { %1865 = vmatpush3.bf16.msra.mxu0 %v2513_v47 }
 0x581   :  { %1866 = vmatprep.subr.bf16.mxu0 %v2135_v0 }
 0x584   :  { %1867 = vmatpush3.bf16.msra.mxu0 %v2533_v54 }
 0x585   :  { %1868 = vmatprep.subr.bf16.mxu0 %v2135_v0 }
 0x588   :  { %1869 = vmatpush3.bf16.msra.mxu0 %v2542_v62 }
 0x589   :  { %1870 = vmatprep.subr.bf16.mxu0 %v2135_v0 }
 0x58c   :  { %1871 = vmatpush3.bf16.msra.mxu0 %v2551_v63 }
 0x58d   :  { %1872 = vmatprep.subr.bf16.mxu0 %v2135_v0 }
 0x590   :  { %1873 = vmatpush3.bf16.msra.mxu0 %v2560_v2 }
 0x591   :  { %1898 = vmatprep.subr.bf16.mxu0 %v2135_v0 }
 0x646   :  { %v658_v49 = vpop.f32.mrb[24].mxu0 }
 0x647   :  { %v664_v50 = vadd.f32 %v658_v49, %v167_v48  ;;  %v1836_v51 = vpop.f32.mrb[25].mxu0 }
 0x648   :  { %v661_v52 = vpop.f32.mrb[26].mxu0 }
 0x649   :  { %2083 = vtanh.f32 %v664_v50  ;;  %v1837_v53 = vpop.f32.mrb[27].mxu0 }
 0x653   :  { %v2084_v55 = vpop.eup %2083 }
 0x654   :  { %v670_v57 = vpack.c.bf16 %v2084_v55, %v2084_v55 }
 0x656   :  { %1855 = vmatmul.mubr.bf16.vlgmr.msra.gmra.mrb[16].mxu1 %v670_v57 }
 0x657   :  { %1879 = vmatpush3.bf16.msra.mxu1 %v2493_v18  ;;  %1894 = vmatprep.mubr.msk.bf16.mxu1 %vm2137_vm2, %v2135_v0 }
 0x658   :  { %1880 = vmatprep.subr.bf16.mxu1 %v2135_v0 }
 0x65b   :  { %1881 = vmatpush3.bf16.msra.mxu1 %v2499_v19 }
 0x65c   :  { %1882 = vmatprep.subr.bf16.mxu1 %v2135_v0 }
 0x65f   :  { %1883 = vmatpush3.bf16.msra.mxu1 %v2506_v46 }
 0x660   :  { %1884 = vmatprep.subr.bf16.mxu1 %v2135_v0 }
 0x663   :  { %1885 = vmatpush3.bf16.msra.mxu1 %v2513_v47 }
 0x664   :  { %1886 = vmatprep.subr.bf16.mxu1 %v2135_v0 }
 0x667   :  { %1887 = vmatpush3.bf16.msra.mxu1 %v2533_v54 }
 0x668   :  { %1888 = vmatprep.subr.bf16.mxu1 %v2135_v0 }
 0x66b   :  { %1889 = vmatpush3.bf16.msra.mxu1 %v2542_v62 }
 0x66c   :  { %1890 = vmatprep.subr.bf16.mxu1 %v2135_v0 }
 0x66f   :  { %1891 = vmatpush3.bf16.msra.mxu1 %v2551_v63 }
 0x670   :  { %1892 = vmatprep.subr.bf16.mxu1 %v2135_v0 }
 0x673   :  { %1893 = vmatpush3.bf16.msra.mxu1 %v2560_v2 }
 0x674   :  { %1918 = vmatprep.subr.bf16.mxu1 %v2135_v0 }
 0x729   :  { %v705_v5 = vpop.f32.mrb[16].mxu1 }
 0x72a   :  { %v711_v7 = vadd.f32 %v705_v5, %v170_v3  ;;  %v1856_v8 = vpop.f32.mrb[17].mxu1  ;;  %v2067_v3 = vld [vmem:[%s2890_s8 + $0x20] sm:$0xff]   ;;  %v2068_v5 = vld [vmem:[%s2890_s8 + $0x28] sm:$0xff]  }
 0x72b   :  { %v708_v9 = vpop.f32.mrb[18].mxu1  ;;  %v2070_v8 = vld [vmem:[%s2890_s8 + $0x38] sm:$0xff]  }
 0x72c   :  { %2085 = vtanh.f32 %v711_v7  ;;  %v1857_v14 = vpop.f32.mrb[19].mxu1  ;;  %v2069_v7 = vld [vmem:[%s2890_s8 + $0x30] sm:$0xff]  }
 0x736   :  { %v2086_v20 = vpop.eup %2085 }
 0x737   :  { %v716_v21 = vpack.c.bf16 %v2086_v20, %v2086_v20  ;;  %v276_v20 = vadd.f32 %v2418_v10, %v2589_v39 }
 0x739   :  { %1875 = vmatmul.mubr.bf16.vlgmr.msra.gmra.mrb[28].mxu0 %v716_v21 }
 0x73a   :  { %1899 = vmatpush3.bf16.msra.mxu0 %v2493_v18  ;;  %1914 = vmatprep.mubr.msk.bf16.mxu0 %vm2137_vm2, %v2135_v0 }
 0x73b   :  { %1900 = vmatprep.subr.bf16.mxu0 %v2135_v0 }
 0x73e   :  { %1901 = vmatpush3.bf16.msra.mxu0 %v2499_v19 }
 0x73f   :  { %1902 = vmatprep.subr.bf16.mxu0 %v2135_v0 }
 0x742   :  { %1903 = vmatpush3.bf16.msra.mxu0 %v2506_v46 }
 0x743   :  { %1904 = vmatprep.subr.bf16.mxu0 %v2135_v0 }
 0x746   :  { %1905 = vmatpush3.bf16.msra.mxu0 %v2513_v47 }
 0x747   :  { %1906 = vmatprep.subr.bf16.mxu0 %v2135_v0 }
 0x74a   :  { %1907 = vmatpush3.bf16.msra.mxu0 %v2533_v54 }
 0x74b   :  { %1908 = vmatprep.subr.bf16.mxu0 %v2135_v0 }
 0x74e   :  { %1909 = vmatpush3.bf16.msra.mxu0 %v2542_v62 }
 0x74f   :  { %1910 = vmatprep.subr.bf16.mxu0 %v2135_v0 }
 0x752   :  { %1911 = vmatpush3.bf16.msra.mxu0 %v2551_v63 }
 0x753   :  { %1912 = vmatprep.subr.bf16.mxu0 %v2135_v0 }
 0x756   :  { %1913 = vmatpush3.bf16.msra.mxu0 %v2560_v2 }
 0x757   :  { %1938 = vmatprep.subr.bf16.mxu0 %v2135_v0 }
 0x80c   :  { %v799_v22 = vpop.f32.mrb[28].mxu0 }
 0x80d   :  { %v805_v23 = vadd.f32 %v799_v22, %v252_v56  ;;  %v1876_v24 = vpop.f32.mrb[29].mxu0 }
 0x80e   :  { %v802_v25 = vpop.f32.mrb[30].mxu0 }
 0x80f   :  { %2087 = vtanh.f32 %v805_v23  ;;  %v1877_v26 = vpop.f32.mrb[31].mxu0 }
 0x819   :  { %v2593_v27 = vpop.eup %2087 }
 0x81a   :  { %v812_v28 = vpack.c.bf16 %v2593_v27, %v2593_v27 }
 0x81c   :  { %1895 = vmatmul.mubr.bf16.vlgmr.msra.gmra.mrb[20].mxu1 %v812_v28 }
 0x81d   :  { %1919 = vmatpush3.bf16.msra.mxu1 %v2493_v18  ;;  %1934 = vmatprep.mubr.msk.bf16.mxu1 %vm2137_vm2, %v2135_v0 }
 0x81e   :  { %1920 = vmatprep.subr.bf16.mxu1 %v2135_v0 }
 0x821   :  { %1921 = vmatpush3.bf16.msra.mxu1 %v2499_v19 }
 0x822   :  { %1922 = vmatprep.subr.bf16.mxu1 %v2135_v0 }
 0x825   :  { %1923 = vmatpush3.bf16.msra.mxu1 %v2506_v46 }
 0x826   :  { %1924 = vmatprep.subr.bf16.mxu1 %v2135_v0 }
 0x829   :  { %1925 = vmatpush3.bf16.msra.mxu1 %v2513_v47 }
 0x82a   :  { %1926 = vmatprep.subr.bf16.mxu1 %v2135_v0 }
 0x82d   :  { %1927 = vmatpush3.bf16.msra.mxu1 %v2533_v54 }
 0x82e   :  { %1928 = vmatprep.subr.bf16.mxu1 %v2135_v0 }
 0x831   :  { %1929 = vmatpush3.bf16.msra.mxu1 %v2542_v62 }
 0x832   :  { %1930 = vmatprep.subr.bf16.mxu1 %v2135_v0 }
 0x835   :  { %1931 = vmatpush3.bf16.msra.mxu1 %v2551_v63 }
 0x836   :  { %1932 = vmatprep.subr.bf16.mxu1 %v2135_v0 }
 0x839   :  { %1933 = vmatpush3.bf16.msra.mxu1 %v2560_v2 }
 0x83a   :  { %1958 = vmatprep.subr.bf16.mxu1 %v2135_v0 }
 0x8ef   :  { %v847_v29 = vpop.f32.mrb[20].mxu1 }
 0x8f0   :  { %v853_v30 = vadd.f32 %v847_v29, %v255_v59  ;;  %v1896_v31 = vpop.f32.mrb[21].mxu1 }
 0x8f1   :  { %v850_v32 = vpop.f32.mrb[22].mxu1 }
 0x8f2   :  { %2089 = vtanh.f32 %v853_v30  ;;  %v1897_v33 = vpop.f32.mrb[23].mxu1 }
 0x8fc   :  { %v2617_v34 = vpop.eup %2089 }
 0x8fd   :  { %v861_v35 = vpack.c.bf16 %v2617_v34, %v2617_v34 }
 0x8ff   :  { %1915 = vmatmul.mubr.bf16.vlgmr.msra.gmra.mrb[32].mxu0 %v861_v35 }
 0x900   :  { %1939 = vmatpush3.bf16.msra.mxu0 %v2493_v18  ;;  %1954 = vmatprep.mubr.msk.bf16.mxu0 %vm2137_vm2, %v2135_v0 }
 0x901   :  { %1940 = vmatprep.subr.bf16.mxu0 %v2135_v0 }
 0x904   :  { %1941 = vmatpush3.bf16.msra.mxu0 %v2499_v19 }
 0x905   :  { %1942 = vmatprep.subr.bf16.mxu0 %v2135_v0 }
 0x908   :  { %1943 = vmatpush3.bf16.msra.mxu0 %v2506_v46 }
 0x909   :  { %1944 = vmatprep.subr.bf16.mxu0 %v2135_v0 }
 0x90c   :  { %1945 = vmatpush3.bf16.msra.mxu0 %v2513_v47 }
 0x90d   :  { %1946 = vmatprep.subr.bf16.mxu0 %v2135_v0 }
 0x910   :  { %1947 = vmatpush3.bf16.msra.mxu0 %v2533_v54 }
 0x911   :  { %1948 = vmatprep.subr.bf16.mxu0 %v2135_v0 }
 0x914   :  { %1949 = vmatpush3.bf16.msra.mxu0 %v2542_v62 }
 0x915   :  { %1950 = vmatprep.subr.bf16.mxu0 %v2135_v0 }
 0x918   :  { %1951 = vmatpush3.bf16.msra.mxu0 %v2551_v63 }
 0x919   :  { %1952 = vmatprep.subr.bf16.mxu0 %v2135_v0 }
 0x91c   :  { %1953 = vmatpush3.bf16.msra.mxu0 %v2560_v2 }
 0x91d   :  { %1978 = vmatprep.subr.bf16.mxu0 %v2135_v0 }
 0x9d2   :  { %v896_v36 = vpop.f32.mrb[32].mxu0 }
 0x9d3   :  { %v902_v37 = vadd.f32 %v896_v36, %v260_v61  ;;  %v1916_v38 = vpop.f32.mrb[33].mxu0 }
 0x9d4   :  { %v899_v40 = vpop.f32.mrb[34].mxu0 }
 0x9d5   :  { %2091 = vtanh.f32 %v902_v37  ;;  %v1917_v41 = vpop.f32.mrb[35].mxu0 }
 0x9df   :  { %v2641_v42 = vpop.eup %2091 }
 0x9e0   :  { %v910_v43 = vpack.c.bf16 %v2641_v42, %v2641_v42 }
 0x9e2   :  { %1935 = vmatmul.mubr.bf16.vlgmr.msra.gmra.mrb[24].mxu1 %v910_v43 }
 0x9e3   :  { %1959 = vmatpush3.bf16.msra.mxu1 %v2493_v18  ;;  %1974 = vmatprep.mubr.msk.bf16.mxu1 %vm2137_vm2, %v2135_v0 }
 0x9e4   :  { %1960 = vmatprep.subr.bf16.mxu1 %v2135_v0 }
 0x9e7   :  { %1961 = vmatpush3.bf16.msra.mxu1 %v2499_v19 }
 0x9e8   :  { %1962 = vmatprep.subr.bf16.mxu1 %v2135_v0 }
 0x9eb   :  { %1963 = vmatpush3.bf16.msra.mxu1 %v2506_v46 }
 0x9ec   :  { %1964 = vmatprep.subr.bf16.mxu1 %v2135_v0 }
 0x9ef   :  { %1965 = vmatpush3.bf16.msra.mxu1 %v2513_v47 }
 0x9f0   :  { %1966 = vmatprep.subr.bf16.mxu1 %v2135_v0 }
 0x9f3   :  { %1967 = vmatpush3.bf16.msra.mxu1 %v2533_v54 }
 0x9f4   :  { %1968 = vmatprep.subr.bf16.mxu1 %v2135_v0 }
 0x9f7   :  { %1969 = vmatpush3.bf16.msra.mxu1 %v2542_v62 }
 0x9f8   :  { %1970 = vmatprep.subr.bf16.mxu1 %v2135_v0 }
 0x9fb   :  { %1971 = vmatpush3.bf16.msra.mxu1 %v2551_v63 }
 0x9fc   :  { %1972 = vmatprep.subr.bf16.mxu1 %v2135_v0 }
 0x9ff   :  { %1973 = vmatpush3.bf16.msra.mxu1 %v2560_v2 }
 0xa00   :  { %1998 = vmatprep.subr.bf16.mxu1 %v2135_v0 }
 0xab5   :  { %v945_v1 = vpop.f32.mrb[24].mxu1 }
 0xab6   :  { %v951_v4 = vadd.f32 %v945_v1, %v263_v58  ;;  %v1936_v6 = vpop.f32.mrb[25].mxu1 }
 0xab7   :  { %v948_v15 = vpop.f32.mrb[26].mxu1 }
 0xab8   :  { %2093 = vtanh.f32 %v951_v4  ;;  %v1937_v16 = vpop.f32.mrb[27].mxu1 }
 0xac2   :  { %v2665_v44 = vpop.eup %2093 }
 0xac3   :  { %v959_v17 = vpack.c.bf16 %v2665_v44, %v2665_v44  ;;  %v1161_v9 = vpack.c.bf16 %v2665_v44, %v2641_v42 }
 0xac5   :  { %1955 = vmatmul.mubr.bf16.vlgmr.msra.gmra.mrb[36].mxu0 %v959_v17 }
 0xac6   :  { %1979 = vmatpush3.bf16.msra.mxu0 %v2493_v18  ;;  %1994 = vmatprep.mubr.msk.bf16.mxu0 %vm2137_vm2, %v2135_v0 }
 0xac7   :  { %1980 = vmatprep.subr.bf16.mxu0 %v2135_v0 }
 0xaca   :  { %1981 = vmatpush3.bf16.msra.mxu0 %v2499_v19 }
 0xacb   :  { %1982 = vmatprep.subr.bf16.mxu0 %v2135_v0 }
 0xace   :  { %1983 = vmatpush3.bf16.msra.mxu0 %v2506_v46 }
 0xacf   :  { %1984 = vmatprep.subr.bf16.mxu0 %v2135_v0 }
 0xad2   :  { %1985 = vmatpush3.bf16.msra.mxu0 %v2513_v47 }
 0xad3   :  { %1986 = vmatprep.subr.bf16.mxu0 %v2135_v0 }
 0xad6   :  { %1987 = vmatpush3.bf16.msra.mxu0 %v2533_v54 }
 0xad7   :  { %1988 = vmatprep.subr.bf16.mxu0 %v2135_v0 }
 0xada   :  { %1989 = vmatpush3.bf16.msra.mxu0 %v2542_v62 }
 0xadb   :  { %1990 = vmatprep.subr.bf16.mxu0 %v2135_v0 }
 0xade   :  { %1991 = vmatpush3.bf16.msra.mxu0 %v2551_v63 }
 0xadf   :  { %1992 = vmatprep.subr.bf16.mxu0 %v2135_v0 }
 0xae2   :  { %1993 = vmatpush3.bf16.msra.mxu0 %v2560_v2 }
 0xae3   :  { %2018 = vmatprep.subr.bf16.mxu0 %v2063_v11 }
 0xb98   :  { %v994_v45 = vpop.f32.mrb[36].mxu0 }
 0xb99   :  { %v1000_v48 = vadd.f32 %v994_v45, %v268_v60  ;;  %v1956_v49 = vpop.f32.mrb[37].mxu0  ;;  %v1428_v45 = vlaneseq }
 0xb9a   :  { %v997_v50 = vpop.f32.mrb[38].mxu0 }
 0xb9b   :  { %2095 = vtanh.f32 %v1000_v48  ;;  %v1957_v51 = vpop.f32.mrb[39].mxu0 }
 0xba5   :  { %v2096_v52 = vpop.eup %2095 }
 0xba6   :  { %v1008_v53 = vpack.c.bf16 %v2096_v52, %v2096_v52 }
 0xba8   :  { %1975 = vmatmul.mubr.bf16.vlgmr.msra.gmra.mrb[28].mxu1 %v1008_v53 }
 0xba9   :  { %1999 = vmatpush3.bf16.msra.mxu1 %v2493_v18  ;;  %2014 = vmatprep.mubr.msk.bf16.mxu1 %vm2137_vm2, %v2135_v0  ;;  %v271_v18 = vadd.f32 %v2589_v39, %v2424_v13  ;;  %v2065_v13 = vld [vmem:[%s2890_s8 + $0x10] sm:$0xff]  }
 0xbaa   :  { %2000 = vmatprep.subr.bf16.mxu1 %v2135_v0 }
 0xbad   :  { %2001 = vmatpush3.bf16.msra.mxu1 %v2499_v19 }
 0xbae   :  { %2002 = vmatprep.subr.bf16.mxu1 %v2135_v0 }
 0xbb1   :  { %2003 = vmatpush3.bf16.msra.mxu1 %v2506_v46 }
 0xbb2   :  { %2004 = vmatprep.subr.bf16.mxu1 %v2135_v0 }
 0xbb5   :  { %2005 = vmatpush3.bf16.msra.mxu1 %v2513_v47 }
 0xbb6   :  { %2006 = vmatprep.subr.bf16.mxu1 %v2135_v0 }
 0xbb9   :  { %2007 = vmatpush3.bf16.msra.mxu1 %v2533_v54 }
 0xbba   :  { %2008 = vmatprep.subr.bf16.mxu1 %v2135_v0 }
 0xbbd   :  { %2009 = vmatpush3.bf16.msra.mxu1 %v2542_v62 }
 0xbbe   :  { %2010 = vmatprep.subr.bf16.mxu1 %v2135_v0 }
 0xbc1   :  { %2011 = vmatpush3.bf16.msra.mxu1 %v2551_v63  ;;  %v1160_v63 = vpack.c.bf16 %v2617_v34, %v2593_v27  ;;  %v2744_v27 = vld [vmem:[%s2891_s9] ss:$0 sm:$0xff] }
 0xbc2   :  { %2012 = vmatprep.subr.bf16.mxu1 %v2135_v0  ;;  %v2064_v0 = vld [vmem:[%s2890_s8 + $0x8] sm:$0xff]  }
 0xbc5   :  { %2013 = vmatpush3.bf16.msra.mxu1 %v2560_v2  ;;  %v2066_v2 = vld [vmem:[%s2890_s8 + $0x18] sm:$0xff]  }
 0xc7b   :  { %v1043_v19 = vpop.f32.mrb[28].mxu1 }
 0xc7c   :  { %v1049_v46 = vadd.f32 %v1043_v19, %v271_v18  ;;  %v1976_v47 = vpop.f32.mrb[29].mxu1 }
 0xc7d   :  { %v1046_v55 = vpop.f32.mrb[30].mxu1 }
 0xc7e   :  { %2097 = vtanh.f32 %v1049_v46  ;;  %v1977_v57 = vpop.f32.mrb[31].mxu1 }
 0xc88   :  { %v2098_v54 = vpop.eup %2097 }
 0xc89   :  { %v1057_v62 = vpack.c.bf16 %v2098_v54, %v2098_v54  ;;  %v1162_v14 = vpack.c.bf16 %v2098_v54, %v2096_v52  ;;  %v2762_v52 = vand.u32 127, %v1428_v45 }
 0xc8b   :  { %1995 = vmatmul.mubr.bf16.vlgmr.msra.gmra.mrb[40].mxu0 %v1057_v62  ;;  %vm1440_vm5 = vcmp.eq.s32.totalorder %v2762_v52, 2  ;;  %vm1430_vm10 = vcmp.eq.s32.totalorder %v2762_v52, 0  ;;  %vm1431_vm11 = vcmp.eq.s32.totalorder %v2762_v52, 1 }
 0xc8c   :  { %2019 = vmatpush3.bf16.msra.mxu0 %v2063_v11  ;;  %2034 = vmatprep.mubr.bf16.mxu0 %v1160_v63 }
 0xc8d   :  { %2020 = vmatprep.subr.bf16.mxu0 %v2064_v0 }
 0xc90   :  { %2021 = vmatpush3.bf16.msra.mxu0 %v2064_v0 }
 0xc91   :  { %2022 = vmatprep.subr.bf16.mxu0 %v2065_v13 }
 0xc94   :  { %2023 = vmatpush3.bf16.msra.mxu0 %v2065_v13 }
 0xc95   :  { %2024 = vmatprep.subr.bf16.mxu0 %v2066_v2 }
 0xc98   :  { %2025 = vmatpush3.bf16.msra.mxu0 %v2066_v2 }
 0xc99   :  { %2026 = vmatprep.subr.bf16.mxu0 %v2067_v3 }
 0xc9c   :  { %2027 = vmatpush3.bf16.msra.mxu0 %v2067_v3 }
 0xc9d   :  { %2028 = vmatprep.subr.bf16.mxu0 %v2068_v5 }
 0xca0   :  { %2029 = vmatpush3.bf16.msra.mxu0 %v2068_v5 }
 0xca1   :  { %2030 = vmatprep.subr.bf16.mxu0 %v2069_v7 }
 0xca4   :  { %2031 = vmatpush3.bf16.msra.mxu0 %v2069_v7 }
 0xca5   :  { %2032 = vmatprep.subr.bf16.mxu0 %v2070_v8 }
 0xca8   :  { %2033 = vmatpush3.bf16.msra.mxu0 %v2070_v8 }
 0xcab   :  { %2035 = vmatmul.mubr.bf16.vlgmr.msra.gmra.mrb[44].mxu0 %v1161_v9 }
 0xcac   :  { %2038 = vmatprep.mubr.bf16.mxu0 %v1162_v14 }
 0xd5e   :  { %v1092_v21 = vpop.f32.mrb[40].mxu0 }
 0xd5f   :  { %v1098_v56 = vadd.f32 %v1092_v21, %v276_v20  ;;  %v1996_v22 = vpop.f32.mrb[41].mxu0 }
 0xd60   :  { %v1095_v23 = vpop.f32.mrb[42].mxu0 }
 0xd61   :  { %2099 = vtanh.f32 %v1098_v56  ;;  %v1997_v24 = vpop.f32.mrb[43].mxu0 }
 0xd6b   :  { %v2737_v25 = vpop.eup %2099 }
 0xd6c   :  { %v1106_v26 = vpack.c.bf16 %v2737_v25, %v2737_v25 }
 0xd6e   :  { %2015 = vmatmul.mubr.bf16.vlgmr.msra.gmra.mrb[32].mxu1 %v1106_v26 }
 0xd7e   :  { %v2036_v28 = vpop.f32.mrb[44].mxu0 }
 0xd7f   :  { %v2747_v10 = vadd.f32 %v2036_v28, %v2744_v27  ;;  %v1269_v59 = vpop.f32.mrb[45].mxu0 }
 0xd80   :  { %v2750_v29 = vadd.f32 %v2744_v27, %v1269_v59  ;;  %v2037_v30 = vpop.f32.mrb[46].mxu0 }
 0xd81   :  { %v1310_v31 = vand.u32 2147483647, %v2747_v10  ;;  %v2754_v32 = vadd.f32 %v2037_v30, %v2744_v27  ;;  %v1272_v33 = vpop.f32.mrb[47].mxu0  ;;  %v1302_v57 = vmax.f32 %v2747_v10, 0.0 }
 0xd82   :  { %v1308_v34 = vand.u32 2147483647, %v2750_v29  ;;  %v2758_v35 = vadd.f32 %v2744_v27, %v1272_v33  ;;  %v1300_v13 = vmax.f32 %v2750_v29, 0.0 }
 0xd83   :  { %v1318_v61 = vsub.f32 0.0, %v1310_v31  ;;  %v1311_v36 = vand.u32 2147483647, %v2754_v32  ;;  %v1303_v23 = vmax.f32 %v2754_v32, 0.0 }
 0xd84   :  { %v1316_v37 = vsub.f32 0.0, %v1308_v34  ;;  %v1309_v38 = vand.u32 2147483647, %v2758_v35  ;;  %v1301_v33 = vmax.f32 %v2758_v35, 0.0 }
 0xd85   :  { %v1328_v40 = vmul.f32 1.442695, %v1318_v61  ;;  %v1319_v41 = vsub.f32 0.0, %v1311_v36 }
 0xd86   :  { %v1324_v42 = vmul.f32 1.442695, %v1316_v37  ;;  %v1317_v43 = vsub.f32 0.0, %v1309_v38 }
 0xd87   :  { %2101 = vpow2.f32 %v1328_v40  ;;  %v1330_v58 = vmul.f32 1.442695, %v1319_v41 }
 0xd88   :  { %2103 = vpow2.f32 %v1324_v42  ;;  %v1326_v1 = vmul.f32 1.442695, %v1317_v43 }
 0xd89   :  { %2105 = vpow2.f32 %v1330_v58 }
 0xd8a   :  { %2107 = vpow2.f32 %v1326_v1 }
 0xd91   :  { %v2102_v4 = vpop.eup %2101 }
 0xd92   :  { %v2104_v6 = vpop.eup %2103  ;;  %v1358_v15 = vadd.f32 1.0, %v2102_v4  ;;  %v1361_v49 = vmul.f32 -0.5, %v2102_v4  ;;  %v1364_v18 = vand.u32 2147483647, %v2102_v4 }
 0xd93   :  { %v2106_v16 = vpop.eup %2105  ;;  %v1340_v44 = vadd.f32 1.0, %v2104_v6  ;;  %v1343_v50 = vmul.f32 -0.5, %v2104_v6  ;;  %v1346_v46 = vand.u32 2147483647, %v2104_v6 }
 0xd94   :  { %v2108_v17 = vpop.eup %2107  ;;  %2109 = vlog2.f32 %v1358_v15  ;;  %v1367_v60 = vadd.f32 1.0, %v2106_v16  ;;  %v1370_v51 = vmul.f32 -0.5, %v2106_v16  ;;  %v1362_v53 = vadd.f32 1.0, %v1361_v49 }
 0xd95   :  { %2111 = vlog2.f32 %v1340_v44  ;;  %v1349_v48 = vadd.f32 1.0, %v2108_v17  ;;  %v1352_v11 = vmul.f32 -0.5, %v2108_v17  ;;  %v1344_v19 = vadd.f32 1.0, %v1343_v50 }
 0xd96   :  { %2113 = vlog2.f32 %v1367_v60  ;;  %v1371_v47 = vadd.f32 1.0, %v1370_v51  ;;  %v1373_v54 = vand.u32 2147483647, %v2106_v16  ;;  %v1363_v63 = vmul.f32 %v2102_v4, %v1362_v53 }
 0xd97   :  { %2115 = vlog2.f32 %v1349_v48  ;;  %v1353_v2 = vadd.f32 1.0, %v1352_v11  ;;  %vm1365_vm6 = vcmp.lt.f32.partialorder %v1364_v18, 0.0004427343  ;;  %v1345_v7 = vmul.f32 %v2104_v6, %v1344_v19 }
 0xd98   :  { %v1355_v8 = vand.u32 2147483647, %v2108_v17  ;;  %vm1347_vm7 = vcmp.lt.f32.partialorder %v1346_v46, 0.0004427343  ;;  %v1372_v20 = vmul.f32 %v2106_v16, %v1371_v47  ;;  %vm1374_vm8 = vcmp.lt.f32.partialorder %v1373_v54, 0.0004427343 }
 0xd99   :  { %v1354_v59 = vmul.f32 %v2108_v17, %v1353_v2 }
 0xd9a   :  { %vm1356_vm9 = vcmp.lt.f32.partialorder %v1355_v8, 0.0004427343 }
 0xd9e   :  { %v2110_v55 = vpop.eup %2109 }
 0xd9f   :  { %v2112_v62 = vpop.eup %2111  ;;  %v1360_v0 = vmul.f32 0.6931472, %v2110_v55 }
 0xda0   :  { %v2114_v3 = vpop.eup %2113  ;;  %v1342_v5 = vmul.f32 0.6931472, %v2112_v62 }
 0xda1   :  { %v1366_v9 = vsel %vm1365_vm6, %v1363_v63, %v1360_v0  ;;  %v1369_v14 = vmul.f32 0.6931472, %v2114_v3  ;;  %v2116_v21 = vpop.eup %2115 }
 0xda2   :  { %v1414_v56 = vadd.f32 %v1366_v9, %v1302_v57  ;;  %v1348_v22 = vsel %vm1347_vm7, %v1345_v7, %v1342_v5  ;;  %v1351_v28 = vmul.f32 0.6931472, %v2116_v21 }
 0xda3   :  { %v1412_v24 = vadd.f32 %v1348_v22, %v1300_v13  ;;  %v1375_v26 = vsel %vm1374_vm8, %v1372_v20, %v1369_v14 }
 0xda4   :  { %v1422_v30 = vmax.f32 %v1414_v56, 1e-08  ;;  %v1415_v31 = vadd.f32 %v1375_v26, %v1303_v23  ;;  %v1357_v61 = vsel %vm1356_vm9, %v1354_v59, %v1351_v28 }
 0xda5   :  { %v1420_v34 = vmax.f32 %v1412_v24, 1e-08  ;;  %v1413_v40 = vadd.f32 %v1357_v61, %v1301_v33 }
 0xda6   :  { %v1434_v36 = vmul.f32 %v1422_v30, %v1422_v30  ;;  %v1443_v37 = vsel %vm1440_vm5, 1e-09, %v1422_v30  ;;  %v1423_v38 = vmax.f32 %v1415_v31, 1e-08 }
 0xda7   :  { %v1432_v41 = vmul.f32 %v1420_v34, %v1420_v34  ;;  %v1441_v42 = vsel %vm1440_vm5, 1e-09, %v1420_v34  ;;  %v1421_v4 = vmax.f32 %v1413_v40, 1e-08 }
 0xda8   :  { %v1451_v43 = vsel %vm1431_vm11, %v1434_v36, %v1443_v37  ;;  %v1435_v58 = vmul.f32 %v1423_v38, %v1423_v38  ;;  %v1444_v1 = vsel %vm1440_vm5, 1e-09, %v1423_v38 }
 0xda9   :  { %v1459_v6 = vsel %vm1430_vm10, %v2747_v10, %v1451_v43  ;;  %v1449_v15 = vsel %vm1431_vm11, %v1432_v41, %v1441_v42  ;;  %v1433_v17 = vmul.f32 %v1421_v4, %v1421_v4  ;;  %v1442_v60 = vsel %vm1440_vm5, 1e-09, %v1421_v4 }
 0xdaa   :  { %1467 = vst.msk [vmem:[%s2892_s10 + $0x10] sm:$0xff] %vm201_vm4, %v1459_v6  ;;  %v1457_v16 = vsel %vm1430_vm10, %v2750_v29, %v1449_v15  ;;  %v1452_v44 = vsel %vm1431_vm11, %v1435_v58, %v1444_v1 }
 0xdab   :  { %1465 = vst.msk [vmem:[%s2892_s10] sm:$0xff] %vm201_vm4, %v1457_v16  ;;  %v1460_v10 = vsel %vm1430_vm10, %v2754_v32, %v1452_v44  ;;  %v1450_v29 = vsel %vm1431_vm11, %v1433_v17, %v1442_v60  ;;  %v279_v32 = vadd.f32 %v2422_v12, %v2589_v39 }
 0xdac   :  { %1468 = vst.msk [vmem:[%s2892_s10 + $0x18] sm:$0xff] %vm201_vm4, %v1460_v10  ;;  %v1458_v45 = vsel %vm1430_vm10, %v2758_v35, %v1450_v29 }
 0xdad   :  { %1466 = vst.msk [vmem:[%s2892_s10 + $0x8] sm:$0xff] %vm201_vm4, %v1458_v45 }
 0xe41   :  { %v1141_v48 = vpop.f32.mrb[32].mxu1 }
 0xe42   :  { %v1147_v49 = vadd.f32 %v1141_v48, %v279_v32  ;;  %v2016_v50 = vpop.f32.mrb[33].mxu1 }
 0xe43   :  { %v1144_v51 = vpop.f32.mrb[34].mxu1 }
 0xe44   :  { %2117 = vtanh.f32 %v1147_v49  ;;  %v2017_v53 = vpop.f32.mrb[35].mxu1 }
 0xe4e   :  { %v2118_v11 = vpop.eup %2117 }
 0xe4f   :  { %v1163_v18 = vpack.c.bf16 %v2118_v11, %v2737_v25 }
 0xe51   :  { %2039 = vmatmul.mubr.bf16.gmra.mrb[48].mxu0 %v1163_v18 }
 0xf24   :  { %v2040_v19 = vpop.f32.mrb[48].mxu0 }
 0xf25   :  { %v2819_v35 = vadd.f32 %v2040_v19, %v2744_v27  ;;  %v1285_v46 = vpop.f32.mrb[49].mxu0 }
 0xf26   :  { %v2822_v47 = vadd.f32 %v2744_v27, %v1285_v46  ;;  %v2041_v55 = vpop.f32.mrb[50].mxu0 }
 0xf27   :  { %v1314_v12 = vand.u32 2147483647, %v2819_v35  ;;  %v2826_v39 = vadd.f32 %v2041_v55, %v2744_v27  ;;  %v1288_v57 = vpop.f32.mrb[51].mxu0  ;;  %v1306_v38 = vmax.f32 %v2819_v35, 0.0 }
 0xf28   :  { %v1312_v54 = vand.u32 2147483647, %v2822_v47  ;;  %v2830_v25 = vadd.f32 %v2744_v27, %v1288_v57  ;;  %v1304_v58 = vmax.f32 %v2822_v47, 0.0 }
 0xf29   :  { %v1322_v62 = vsub.f32 0.0, %v1314_v12  ;;  %v1315_v0 = vand.u32 2147483647, %v2826_v39  ;;  %v1307_v32 = vmax.f32 %v2826_v39, 0.0 }
 0xf2a   :  { %v1320_v63 = vsub.f32 0.0, %v1312_v54  ;;  %v1313_v13 = vand.u32 2147483647, %v2830_v25  ;;  %v1305_v18 = vmax.f32 %v2830_v25, 0.0 }
 0xf2b   :  { %v1336_v2 = vmul.f32 1.442695, %v1322_v62  ;;  %v1323_v3 = vsub.f32 0.0, %v1315_v0 }
 0xf2c   :  { %v1332_v5 = vmul.f32 1.442695, %v1320_v63  ;;  %v1321_v7 = vsub.f32 0.0, %v1313_v13 }
 0xf2d   :  { %2119 = vpow2.f32 %v1336_v2  ;;  %v1338_v8 = vmul.f32 1.442695, %v1323_v3 }
 0xf2e   :  { %2121 = vpow2.f32 %v1332_v5  ;;  %v1334_v9 = vmul.f32 1.442695, %v1321_v7 }
 0xf2f   :  { %2123 = vpow2.f32 %v1338_v8 }
 0xf30   :  { %2125 = vpow2.f32 %v1334_v9 }
 0xf37   :  { %v2120_v14 = vpop.eup %2119 }
 0xf38   :  { %v2122_v20 = vpop.eup %2121  ;;  %v1394_v27 = vadd.f32 1.0, %v2120_v14  ;;  %v1397_v26 = vmul.f32 -0.5, %v2120_v14  ;;  %v1400_v33 = vand.u32 2147483647, %v2120_v14 }
 0xf39   :  { %v2124_v21 = vpop.eup %2123  ;;  %v1376_v56 = vadd.f32 1.0, %v2122_v20  ;;  %v1379_v28 = vmul.f32 -0.5, %v2122_v20  ;;  %v1382_v61 = vand.u32 2147483647, %v2122_v20 }
 0xf3a   :  { %v2126_v22 = vpop.eup %2125  ;;  %2127 = vlog2.f32 %v1394_v27  ;;  %v1403_v23 = vadd.f32 1.0, %v2124_v21  ;;  %v1406_v59 = vmul.f32 -0.5, %v2124_v21  ;;  %v1398_v30 = vadd.f32 1.0, %v1397_v26 }
 0xf3b   :  { %2129 = vlog2.f32 %v1376_v56  ;;  %v1385_v24 = vadd.f32 1.0, %v2126_v22  ;;  %v1388_v31 = vmul.f32 -0.5, %v2126_v22  ;;  %v1380_v34 = vadd.f32 1.0, %v1379_v28 }
 0xf3c   :  { %2131 = vlog2.f32 %v1403_v23  ;;  %v1407_v36 = vadd.f32 1.0, %v1406_v59  ;;  %v1409_v40 = vand.u32 2147483647, %v2124_v21  ;;  %v1399_v43 = vmul.f32 %v2120_v14, %v1398_v30 }
 0xf3d   :  { %2133 = vlog2.f32 %v1385_v24  ;;  %v1389_v1 = vadd.f32 1.0, %v1388_v31  ;;  %vm1401_vm12 = vcmp.lt.f32.partialorder %v1400_v33, 0.0004427343  ;;  %v1381_v15 = vmul.f32 %v2122_v20, %v1380_v34 }
 0xf3e   :  { %v1391_v16 = vand.u32 2147483647, %v2126_v22  ;;  %vm1383_vm13 = vcmp.lt.f32.partialorder %v1382_v61, 0.0004427343  ;;  %v1408_v60 = vmul.f32 %v2124_v21, %v1407_v36  ;;  %vm1410_vm14 = vcmp.lt.f32.partialorder %v1409_v40, 0.0004427343 }
 0xf3f   :  { %v1390_v51 = vmul.f32 %v2126_v22, %v1389_v1 }
 0xf40   :  { %vm1392_vm15 = vcmp.lt.f32.partialorder %v1391_v16, 0.0004427343 }
 0xf44   :  { %v2128_v37 = vpop.eup %2127 }
 0xf45   :  { %v2130_v41 = vpop.eup %2129  ;;  %v1396_v42 = vmul.f32 0.6931472, %v2128_v37 }
 0xf46   :  { %v2132_v4 = vpop.eup %2131  ;;  %v1378_v6 = vmul.f32 0.6931472, %v2130_v41 }
 0xf47   :  { %v1402_v44 = vsel %vm1401_vm12, %v1399_v43, %v1396_v42  ;;  %v1405_v17 = vmul.f32 0.6931472, %v2132_v4  ;;  %v2134_v10 = vpop.eup %2133 }
 0xf48   :  { %v1418_v29 = vadd.f32 %v1402_v44, %v1306_v38  ;;  %v1384_v45 = vsel %vm1383_vm13, %v1381_v15, %v1378_v6  ;;  %v1387_v50 = vmul.f32 0.6931472, %v2134_v10 }
 0xf49   :  { %v1416_v48 = vadd.f32 %v1384_v45, %v1304_v58  ;;  %v1411_v49 = vsel %vm1410_vm14, %v1408_v60, %v1405_v17 }
 0xf4a   :  { %v1426_v53 = vmax.f32 %v1418_v29, 1e-08  ;;  %v1419_v11 = vadd.f32 %v1411_v49, %v1307_v32  ;;  %v1393_v46 = vsel %vm1392_vm15, %v1390_v51, %v1387_v50 }
 0xf4b   :  { %v1424_v19 = vmax.f32 %v1416_v48, 1e-08  ;;  %v1417_v54 = vadd.f32 %v1393_v46, %v1305_v18 }
 0xf4c   :  { %v1438_v55 = vmul.f32 %v1426_v53, %v1426_v53  ;;  %v1447_v12 = vsel %vm1440_vm5, 1e-09, %v1426_v53  ;;  %v1427_v57 = vmax.f32 %v1419_v11, 1e-08 }
 0xf4d   :  { %v1436_v62 = vmul.f32 %v1424_v19, %v1424_v19  ;;  %v1445_v0 = vsel %vm1440_vm5, 1e-09, %v1424_v19  ;;  %v1425_v3 = vmax.f32 %v1417_v54, 1e-08 }
 0xf4e   :  { %v1455_v63 = vsel %vm1431_vm11, %v1438_v55, %v1447_v12  ;;  %v1439_v13 = vmul.f32 %v1427_v57, %v1427_v57  ;;  %v1448_v2 = vsel %vm1440_vm5, 1e-09, %v1427_v57 }
 0xf4f   :  { %v1463_v5 = vsel %vm1430_vm10, %v2819_v35, %v1455_v63  ;;  %v1453_v7 = vsel %vm1431_vm11, %v1436_v62, %v1445_v0  ;;  %v1437_v14 = vmul.f32 %v1425_v3, %v1425_v3  ;;  %v1446_v20 = vsel %vm1440_vm5, 1e-09, %v1425_v3 }
 0xf50   :  { %1471 = vst.msk [vmem:[%s2892_s10 + $0x30] sm:$0xff] %vm201_vm4, %v1463_v5  ;;  %v1461_v8 = vsel %vm1430_vm10, %v2822_v47, %v1453_v7  ;;  %v1456_v9 = vsel %vm1431_vm11, %v1439_v13, %v1448_v2 }
 0xf51   :  { %1469 = vst.msk [vmem:[%s2892_s10 + $0x20] sm:$0xff] %vm201_vm4, %v1461_v8  ;;  %v1464_v35 = vsel %vm1430_vm10, %v2826_v39, %v1456_v9  ;;  %v1454_v47 = vsel %vm1431_vm11, %v1437_v14, %v1446_v20 }
 0xf52   :  { %1472 = vst.msk [vmem:[%s2892_s10 + $0x38] sm:$0xff] %vm201_vm4, %v1464_v35  ;;  %v1462_v27 = vsel %vm1430_vm10, %v2830_v25, %v1454_v47 }
 0xf53   :  { %1470 = vst.msk [vmem:[%s2892_s10 + $0x28] sm:$0xff] %vm201_vm4, %v1462_v27 }

</bundles_post_ra>
